<compile_context>
chip_gen: v7x
topology: tpu7x:2x2x1
jax: 0.10.0
libtpu: 0.0.40
codegen_flags: <defaults>
</compile_context>

<pallas_src>
import functools

import jax
import jax.numpy as jnp
from jax import lax
from jax.experimental import pallas as pl
from jax.experimental.pallas import tpu as pltpu


# ----------------------------------------------------------------------------
# Fused dense-pixel kernel:
#   per grid step (b, j) on a (c_in, tp) NCHW tile of x:
#     pix  = MLP_pix(x)            (E, tp)      -> heatmap/mask block (2Q, tp)
#     attn = MLP_attn(x)           (C_attn, tp) -> L2-norm over W segments
#                                                -> attn_bias blocks (L*N, Q, tp)
# ----------------------------------------------------------------------------
def _fused_pixel_kernel(seg_w, ln, e_ch,
                        x_ref, qhm_ref,
                        w1p_ref, b1p_ref, w2p_ref, b2p_ref, w3p_ref, b3p_ref,
                        w1a_ref, b1a_ref, w2a_ref, b2a_ref, w3a_ref, b3a_ref,
                        heat_ref, mask_ref, ab_ref):
    cd = w1p_ref.dtype          # compute dtype for MXU operands (f32 or bf16)
    xb = x_ref[...]             # (c_in, tp), already cast to compute dtype

    def mlp_t(w1, b1, w2, b2, w3, b3):
        # channels-as-rows MLP: (out, in) @ (in, tp); f32 accumulation.
        h = jnp.dot(w1[...], xb, preferred_element_type=jnp.float32) + b1[...]
        h = jnp.maximum(h, 0.0)
        h = jnp.dot(w2[...], h.astype(cd), preferred_element_type=jnp.float32) + b2[...]
        h = jnp.maximum(h, 0.0)
        return jnp.dot(w3[...], h.astype(cd), preferred_element_type=jnp.float32) + b3[...]

    # ---- pix path: heatmap & mask in ONE matmul against the shared pix tile --
    pix = mlp_t(w1p_ref, b1p_ref, w2p_ref, b2p_ref, w3p_ref, b3p_ref)        # (E, tp) f32
    qhm = qhm_ref[...]                                                        # (2Q, E)
    q = qhm.shape[0] // 2
    hm = jnp.dot(qhm, pix.astype(cd), preferred_element_type=jnp.float32)     # (2Q, tp)
    heat_ref[...] = hm[:q].astype(heat_ref.dtype)
    mask_ref[...] = hm[q:].astype(mask_ref.dtype)

    # ---- attn path ------------------------------------------------------------
    attn = mlp_t(w1a_ref, b1a_ref, w2a_ref, b2a_ref, w3a_ref, b3a_ref)        # (C_attn, tp) f32

    # F.normalize(attn, dim=-1) on NCHW == L2 norm over each W-length segment of
    # the flattened (lane) spatial axis.  Segmented reduce + broadcast via tiny
    # MXU matmuls against 0/1 selector matrices (stays lane-dense; no reshapes).
    tp = attn.shape[-1]
    nseg = tp // seg_w
    p_col = lax.broadcasted_iota(jnp.int32, (tp, nseg), 0)
    s_col = lax.broadcasted_iota(jnp.int32, (tp, nseg), 1) * seg_w
    sel = ((p_col >= s_col) & (p_col < s_col + seg_w)).astype(jnp.float32)    # (tp, nseg)
    p_row = lax.broadcasted_iota(jnp.int32, (nseg, tp), 1)
    s_row = lax.broadcasted_iota(jnp.int32, (nseg, tp), 0) * seg_w
    sel_t = ((p_row >= s_row) & (p_row < s_row + seg_w)).astype(jnp.float32)  # (nseg, tp)

    seg_sq = jnp.dot(attn * attn, sel, preferred_element_type=jnp.float32)    # (C_attn, nseg)
    inv = 1.0 / jnp.maximum(jnp.sqrt(seg_sq), 1e-12)                          # match F.normalize eps
    scale = jnp.dot(inv, sel_t, preferred_element_type=jnp.float32)           # (C_attn, tp)
    attn_n = attn * scale

    # einsum('bqc,blnchw->blnqhw'): per (layer, head) one (Q,E)@(E,tp) matmul,
    # all consuming the in-VMEM normalized attn tile (never written to HBM).
    qh = qhm[:q, :]                                                           # (Q, E)
    for idx in range(ln):
        blk = attn_n[idx * e_ch:(idx + 1) * e_ch, :].astype(cd)               # (E, tp)
        ab_ref[idx] = jnp.dot(qh, blk,
                              preferred_element_type=jnp.float32).astype(ab_ref.dtype)


# ----------------------------------------------------------------------------
# Helpers
# ----------------------------------------------------------------------------
def _choose_spatial_tile(h, w, target):
    """Largest spatial tile: multiple of W, divisor of H*W, lane-aligned, <= target."""
    p = h * w
    if p <= target:
        return p
    best = None
    for hh in range(1, h + 1):
        if h % hh == 0:
            tp = hh * w
            if tp <= target and tp % 128 == 0:
                best = tp
    return best if best is not None else p


def _prep_mlp_params_t(params, compute_dtype):
    """Transpose Linear / 1x1-Conv weights to (out, in) channels-as-rows form."""
    w1, b1, w2, b2, w3, b3 = params
    cd = compute_dtype
    return (w1.T.astype(cd), b1.reshape(-1, 1).astype(jnp.float32),
            w2.T.astype(cd), b2.reshape(-1, 1).astype(jnp.float32),
            w3.T.astype(cd), b3.reshape(-1, 1).astype(jnp.float32))


def _dense_mlp(x2d, params, compute_dtype):
    """Row-form 3-layer MLP (used for the tiny query path and the reference)."""
    w1, b1, w2, b2, w3, b3 = params
    cd = compute_dtype
    hp = jax.lax.Precision.HIGHEST
    h = jnp.dot(x2d.astype(cd), w1.astype(cd),
                preferred_element_type=jnp.float32, precision=hp) + b1
    h = jnp.maximum(h, 0.0)
    h = jnp.dot(h.astype(cd), w2.astype(cd),
                preferred_element_type=jnp.float32, precision=hp) + b2
    h = jnp.maximum(h, 0.0)
    return jnp.dot(h.astype(cd), w3.astype(cd),
                   preferred_element_type=jnp.float32, precision=hp) + b3


# ----------------------------------------------------------------------------
# Full forward pass
# ----------------------------------------------------------------------------
def mlp_mask_decoder_forward(query, x, params, *, total_heads, total_layers,
                             embed_channels, compute_dtype=jnp.bfloat16,
                             tp_target=512):
    # tp_target: ~512 is a good default for all of v5e/v6e/v7x; v6e (128 MiB VMEM)
    # tolerates 1024, v7x (64 MiB) / v5e (16 MiB scoped default) should stay <=512.
    B, Q, c_in = query.shape
    _, cx, H, W = x.shape
    assert cx == c_in
    P = H * W
    E = embed_channels
    LN = total_layers * total_heads
    cd = compute_dtype
    out_dtype = query.dtype

    # ---- query_mlp: only B*Q rows -> leave to XLA (per perf review) ----------
    query_raw = _dense_mlp(query.reshape(B * Q, c_in), params["query_mlp"], cd)
    query_raw = query_raw.reshape(B, Q, 2 * E)
    # Stack heatmap/mask halves along the row axis -> one shared matmul with pix.
    qhm = jnp.concatenate([query_raw[..., :E], query_raw[..., E:]], axis=1)    # (B, 2Q, E)
    qhm = qhm.astype(cd)

    # ---- fused dense-pixel kernel --------------------------------------------
    tp = _choose_spatial_tile(H, W, tp_target)
    n_tiles = P // tp

    x_flat = x.reshape(B, c_in, P).astype(cd)        # NCHW, spatial flattened (free reshape)
    pix_p = _prep_mlp_params_t(params["pix_mlp"], cd)
    att_p = _prep_mlp_params_t(params["attn_mlp"], cd)

    # TODO(synk): grid-invariant weight specs could be single-buffered
    # (pipeline_mode=pl.Buffered(1)) to reclaim VMEM for larger spatial tiles.
    def const_spec(arr):
        return pl.BlockSpec(arr.shape, lambda b, j: (0, 0))

    kernel = functools.partial(_fused_pixel_kernel, W, LN, E)

    heat, mask, ab = pl.pallas_call(
        kernel,
        out_shape=(jax.ShapeDtypeStruct((B, Q, P), out_dtype),
                   jax.ShapeDtypeStruct((B, Q, P), out_dtype),
                   jax.ShapeDtypeStruct((B, LN, Q, P), out_dtype)),
        grid=(B, n_tiles),
        in_specs=[
            pl.BlockSpec((pl.Squeezed(), c_in, tp), lambda b, j: (b, 0, j)),
            pl.BlockSpec((pl.Squeezed(), 2 * Q, E), lambda b, j: (b, 0, 0)),
            *[const_spec(a) for a in pix_p],
            *[const_spec(a) for a in att_p],
        ],
        out_specs=(
            pl.BlockSpec((pl.Squeezed(), Q, tp), lambda b, j: (b, 0, j)),
            pl.BlockSpec((pl.Squeezed(), Q, tp), lambda b, j: (b, 0, j)),
            pl.BlockSpec((pl.Squeezed(), LN, Q, tp), lambda b, j: (b, 0, 0, j)),
        ),
        compiler_params=pltpu.CompilerParams(
            dimension_semantics=("parallel", "parallel"),
            vmem_limit_bytes=48 * 1024 * 1024),
    )(x_flat, qhm, *pix_p, *att_p)

    heatmap_preds = heat.reshape(B, Q, H, W)
    mask_preds = mask.reshape(B, Q, H, W)
    attn_bias = ab.reshape(B, total_layers, total_heads, Q, H, W)
    # bias_scaling is nn.Identity() (rescale_attn_bias=False) -> no-op.
    return heatmap_preds, mask_preds, [attn_bias[:, l] for l in range(total_layers)]


# ----------------------------------------------------------------------------
# Deterministic parameter init + pure-JAX reference (PyTorch semantics)
# ----------------------------------------------------------------------------
def init_mlp_params(key, c_in, c_hidden, c_out, scale=0.1):
    ks = jax.random.split(key, 6)
    return (
        scale * jax.random.normal(ks[0], (c_in, c_hidden), jnp.float32),
        scale * jax.random.normal(ks[1], (1, c_hidden), jnp.float32),
        scale * jax.random.normal(ks[2], (c_hidden, c_hidden), jnp.float32),
        scale * jax.random.normal(ks[3], (1, c_hidden), jnp.float32),
        scale * jax.random.normal(ks[4], (c_hidden, c_out), jnp.float32),
        scale * jax.random.normal(ks[5], (1, c_out), jnp.float32),
    )


def reference_forward(query, x, params, *, total_heads, total_layers,
                      embed_channels, compute_dtype=jnp.float32):
    B, Q, c_in = query.shape
    _, _, H, W = x.shape
    E = embed_channels
    cd = compute_dtype
    hp = jax.lax.Precision.HIGHEST

    query_raw = _dense_mlp(query.reshape(B * Q, c_in), params["query_mlp"], cd)
    query_raw = query_raw.reshape(B, Q, 2 * E)
    qh, qm = query_raw[..., :E], query_raw[..., E:]

    x_rows = jnp.transpose(x, (0, 2, 3, 1)).reshape(B * H * W, c_in)
    pix = jnp.transpose(_dense_mlp(x_rows, params["pix_mlp"], cd).reshape(B, H, W, E),
                        (0, 3, 1, 2))
    heatmap = jnp.einsum("bqc,bchw->bqhw", qh.astype(cd), pix.astype(cd),
                         preferred_element_type=jnp.float32, precision=hp)
    mask = jnp.einsum("bqc,bchw->bqhw", qm.astype(cd), pix.astype(cd),
                      preferred_element_type=jnp.float32, precision=hp)

    c_attn = E * total_heads * total_layers
    attn = jnp.transpose(_dense_mlp(x_rows, params["attn_mlp"], cd).reshape(B, H, W, c_attn),
                         (0, 3, 1, 2))
    norm = jnp.sqrt(jnp.sum(attn * attn, axis=-1, keepdims=True))
    attn = attn / jnp.maximum(norm, 1e-12)
    attn = attn.reshape(B, total_layers, total_heads, E, H, W)
    ab = jnp.einsum("bqc,blnchw->blnqhw", qh.astype(cd), attn.astype(cd),
                    preferred_element_type=jnp.float32, precision=hp)
    return (heatmap.astype(query.dtype), mask.astype(query.dtype),
            [ab[:, l].astype(query.dtype) for l in range(total_layers)])


if __name__ == "__main__":
    B, Q = 2, 8
    C_IN = 16
    MLP_CH = 32
    EMBED = 32
    HEADS, LAYERS = 2, 2
    H = W = 16

    key = jax.random.PRNGKey(0)
    k_q, k_x, k_p1, k_p2, k_p3 = jax.random.split(key, 5)
    query = jax.random.normal(k_q, (B, Q, C_IN), jnp.float32)
    x = jax.random.normal(k_x, (B, C_IN, H, W), jnp.float32)

    params = {
        "query_mlp": init_mlp_params(k_p1, C_IN, MLP_CH, EMBED * 2),
        "pix_mlp":   init_mlp_params(k_p2, C_IN, MLP_CH, EMBED),
        "attn_mlp":  init_mlp_params(k_p3, C_IN, MLP_CH, EMBED * HEADS * LAYERS),
    }

    common = dict(total_heads=HEADS, total_layers=LAYERS, embed_channels=EMBED)

    # f32 compute path: tight check against the PyTorch-semantics reference.
    fwd_f32 = jax.jit(functools.partial(mlp_mask_decoder_forward,
                                        compute_dtype=jnp.float32, **common))
    h32, m32, ab32 = jax.block_until_ready(fwd_f32(query, x, params))
    rh, rm, rab = reference_forward(query, x, params, compute_dtype=jnp.float32, **common)
    assert h32.shape == (B, Q, H, W) and m32.shape == (B, Q, H, W)
    assert len(ab32) == LAYERS and ab32[0].shape == (B, HEADS, Q, H, W)
    assert jnp.allclose(h32, rh, atol=1e-3, rtol=1e-3)
    assert jnp.allclose(m32, rm, atol=1e-3, rtol=1e-3)
    for a, r in zip(ab32, rab):
        assert jnp.allclose(a, r, atol=1e-3, rtol=1e-3)

    # bf16 compute path (perf-review recommendation): checked against a
    # precision-matched reference with looser tolerances.
    fwd_bf16 = jax.jit(functools.partial(mlp_mask_decoder_forward,
                                         compute_dtype=jnp.bfloat16, **common))
    h16, m16, ab16 = jax.block_until_ready(fwd_bf16(query, x, params))
    rh16, rm16, rab16 = reference_forward(query, x, params,
                                          compute_dtype=jnp.bfloat16, **common)
    assert jnp.allclose(h16, rh16, atol=1e-2, rtol=1e-2)
    assert jnp.allclose(m16, rm16, atol=1e-2, rtol=1e-2)
    for a, r in zip(ab16, rab16):
        assert jnp.allclose(a, r, atol=1e-2, rtol=1e-2)

    print("KERNEL_OK")
</pallas_src>

<mosaic_0001>
module attributes {stable_mosaic.version = 11 : i64} {
  func.func @_fused_pixel_kernel(%arg0: i32, %arg1: i32, %arg2: memref<1x16x256xf32, #tpu.memory_space<vmem>>, %arg3: memref<1x16x32xf32, #tpu.memory_space<vmem>>, %arg4: memref<32x16xf32, #tpu.memory_space<vmem>>, %arg5: memref<32x1xf32, #tpu.memory_space<vmem>>, %arg6: memref<32x32xf32, #tpu.memory_space<vmem>>, %arg7: memref<32x1xf32, #tpu.memory_space<vmem>>, %arg8: memref<32x32xf32, #tpu.memory_space<vmem>>, %arg9: memref<32x1xf32, #tpu.memory_space<vmem>>, %arg10: memref<32x16xf32, #tpu.memory_space<vmem>>, %arg11: memref<32x1xf32, #tpu.memory_space<vmem>>, %arg12: memref<32x32xf32, #tpu.memory_space<vmem>>, %arg13: memref<32x1xf32, #tpu.memory_space<vmem>>, %arg14: memref<128x32xf32, #tpu.memory_space<vmem>>, %arg15: memref<128x1xf32, #tpu.memory_space<vmem>>, %arg16: memref<1x8x256xf32, #tpu.memory_space<vmem>>, %arg17: memref<1x8x256xf32, #tpu.memory_space<vmem>>, %arg18: memref<1x4x8x256xf32, #tpu.memory_space<vmem>>) attributes {dimension_semantics = [#tpu.dimension_semantics<parallel>, #tpu.dimension_semantics<parallel>], iteration_bounds = array<i64: 2, 1>, scalar_prefetch = 0 : i64, scratch_operands = 0 : i64, tpu.core_type = #tpu.core_type<tc>, window_params = [{transform_indices = @transform_0, window_bounds = array<i64: 1, 16, 256>}, {transform_indices = @transform_1, window_bounds = array<i64: 1, 16, 32>}, {pipeline_mode = #tpu.pipeline_mode<synchronous>, transform_indices = @transform_2, window_bounds = array<i64: 32, 16>}, {pipeline_mode = #tpu.pipeline_mode<synchronous>, transform_indices = @transform_3, window_bounds = array<i64: 32, 1>}, {pipeline_mode = #tpu.pipeline_mode<synchronous>, transform_indices = @transform_4, window_bounds = array<i64: 32, 32>}, {pipeline_mode = #tpu.pipeline_mode<synchronous>, transform_indices = @transform_5, window_bounds = array<i64: 32, 1>}, {pipeline_mode = #tpu.pipeline_mode<synchronous>, transform_indices = @transform_6, window_bounds = array<i64: 32, 32>}, {pipeline_mode = #tpu.pipeline_mode<synchronous>, transform_indices = @transform_7, window_bounds = array<i64: 32, 1>}, {pipeline_mode = #tpu.pipeline_mode<synchronous>, transform_indices = @transform_8, window_bounds = array<i64: 32, 16>}, {pipeline_mode = #tpu.pipeline_mode<synchronous>, transform_indices = @transform_9, window_bounds = array<i64: 32, 1>}, {pipeline_mode = #tpu.pipeline_mode<synchronous>, transform_indices = @transform_10, window_bounds = array<i64: 32, 32>}, {pipeline_mode = #tpu.pipeline_mode<synchronous>, transform_indices = @transform_11, window_bounds = array<i64: 32, 1>}, {pipeline_mode = #tpu.pipeline_mode<synchronous>, transform_indices = @transform_12, window_bounds = array<i64: 128, 32>}, {pipeline_mode = #tpu.pipeline_mode<synchronous>, transform_indices = @transform_13, window_bounds = array<i64: 128, 1>}, {transform_indices = @transform_14, window_bounds = array<i64: 1, 8, 256>}, {transform_indices = @transform_15, window_bounds = array<i64: 1, 8, 256>}, {transform_indices = @transform_16, window_bounds = array<i64: 1, 4, 8, 256>}]} {
    %c0 = arith.constant 0 : index
    %c0_0 = arith.constant 0 : index
    %c0_1 = arith.constant 0 : index
    %0 = vector.load %arg2[%c0, %c0_0, %c0_1] : memref<1x16x256xf32, #tpu.memory_space<vmem>>, vector<1x16x256xf32>
    %1 = vector.shape_cast %0 : vector<1x16x256xf32> to vector<16x256xf32>
    %c0_2 = arith.constant 0 : index
    %c0_3 = arith.constant 0 : index
    %2 = vector.load %arg4[%c0_2, %c0_3] : memref<32x16xf32, #tpu.memory_space<vmem>>, vector<32x16xf32>
    %cst = arith.constant dense<0.000000e+00> : vector<32x256xf32>
    %3 = tpu.matmul %2, %1, %cst {dimension_numbers = #tpu.dot_dimension_numbers<[1], [0], [0], [1], [0, 0, 1, 1], [], []>} : vector<32x16xf32>, vector<16x256xf32>, vector<32x256xf32> -> vector<32x256xf32>
    %c0_4 = arith.constant 0 : index
    %c0_5 = arith.constant 0 : index
    %4 = vector.load %arg5[%c0_4, %c0_5] : memref<32x1xf32, #tpu.memory_space<vmem>>, vector<32x1xf32>
    %5 = vector.broadcast %4 : vector<32x1xf32> to vector<32x256xf32>
    %6 = arith.addf %3, %5 : vector<32x256xf32>
    %cst_6 = arith.constant 0.000000e+00 : f32
    %7 = vector.broadcast %cst_6 : f32 to vector<32x256xf32>
    %8 = arith.maximumf %6, %7 : vector<32x256xf32>
    %c0_7 = arith.constant 0 : index
    %c0_8 = arith.constant 0 : index
    %9 = vector.load %arg6[%c0_7, %c0_8] : memref<32x32xf32, #tpu.memory_space<vmem>>, vector<32x32xf32>
    %cst_9 = arith.constant dense<0.000000e+00> : vector<32x256xf32>
    %10 = tpu.matmul %9, %8, %cst_9 {dimension_numbers = #tpu.dot_dimension_numbers<[1], [0], [0], [1], [0, 0, 1, 1], [], []>} : vector<32x32xf32>, vector<32x256xf32>, vector<32x256xf32> -> vector<32x256xf32>
    %c0_10 = arith.constant 0 : index
    %c0_11 = arith.constant 0 : index
    %11 = vector.load %arg7[%c0_10, %c0_11] : memref<32x1xf32, #tpu.memory_space<vmem>>, vector<32x1xf32>
    %12 = vector.broadcast %11 : vector<32x1xf32> to vector<32x256xf32>
    %13 = arith.addf %10, %12 : vector<32x256xf32>
    %cst_12 = arith.constant 0.000000e+00 : f32
    %14 = vector.broadcast %cst_12 : f32 to vector<32x256xf32>
    %15 = arith.maximumf %13, %14 : vector<32x256xf32>
    %c0_13 = arith.constant 0 : index
    %c0_14 = arith.constant 0 : index
    %16 = vector.load %arg8[%c0_13, %c0_14] : memref<32x32xf32, #tpu.memory_space<vmem>>, vector<32x32xf32>
    %cst_15 = arith.constant dense<0.000000e+00> : vector<32x256xf32>
    %17 = tpu.matmul %16, %15, %cst_15 {dimension_numbers = #tpu.dot_dimension_numbers<[1], [0], [0], [1], [0, 0, 1, 1], [], []>} : vector<32x32xf32>, vector<32x256xf32>, vector<32x256xf32> -> vector<32x256xf32>
    %c0_16 = arith.constant 0 : index
    %c0_17 = arith.constant 0 : index
    %18 = vector.load %arg9[%c0_16, %c0_17] : memref<32x1xf32, #tpu.memory_space<vmem>>, vector<32x1xf32>
    %19 = vector.broadcast %18 : vector<32x1xf32> to vector<32x256xf32>
    %20 = arith.addf %17, %19 : vector<32x256xf32>
    %c0_18 = arith.constant 0 : index
    %c0_19 = arith.constant 0 : index
    %c0_20 = arith.constant 0 : index
    %21 = vector.load %arg3[%c0_18, %c0_19, %c0_20] : memref<1x16x32xf32, #tpu.memory_space<vmem>>, vector<1x16x32xf32>
    %22 = vector.shape_cast %21 : vector<1x16x32xf32> to vector<16x32xf32>
    %cst_21 = arith.constant dense<0.000000e+00> : vector<16x256xf32>
    %23 = tpu.matmul %22, %20, %cst_21 {dimension_numbers = #tpu.dot_dimension_numbers<[1], [0], [0], [1], [0, 0, 1, 1], [], []>} : vector<16x32xf32>, vector<32x256xf32>, vector<16x256xf32> -> vector<16x256xf32>
    %24 = vector.extract_strided_slice %23 {offsets = [0, 0], sizes = [8, 256], strides = [1, 1]} : vector<16x256xf32> to vector<8x256xf32>
    %c0_22 = arith.constant 0 : index
    %c0_23 = arith.constant 0 : index
    %c0_24 = arith.constant 0 : index
    %25 = vector.load %arg16[%c0_22, %c0_23, %c0_24] : memref<1x8x256xf32, #tpu.memory_space<vmem>>, vector<1x8x256xf32>
    %26 = vector.shape_cast %25 : vector<1x8x256xf32> to vector<8x256xf32>
    %27 = vector.shape_cast %24 : vector<8x256xf32> to vector<1x8x256xf32>
    tpu.vector_store %arg16[%c0_22, %c0_23, %c0_24], %27 {strides = array<i32>} : memref<1x8x256xf32, #tpu.memory_space<vmem>>, vector<1x8x256xf32>,
    %28 = vector.extract_strided_slice %23 {offsets = [8, 0], sizes = [8, 256], strides = [1, 1]} : vector<16x256xf32> to vector<8x256xf32>
    %c0_25 = arith.constant 0 : index
    %c0_26 = arith.constant 0 : index
    %c0_27 = arith.constant 0 : index
    %29 = vector.load %arg17[%c0_25, %c0_26, %c0_27] : memref<1x8x256xf32, #tpu.memory_space<vmem>>, vector<1x8x256xf32>
    %30 = vector.shape_cast %29 : vector<1x8x256xf32> to vector<8x256xf32>
    %31 = vector.shape_cast %28 : vector<8x256xf32> to vector<1x8x256xf32>
    tpu.vector_store %arg17[%c0_25, %c0_26, %c0_27], %31 {strides = array<i32>} : memref<1x8x256xf32, #tpu.memory_space<vmem>>, vector<1x8x256xf32>,
    %c0_28 = arith.constant 0 : index
    %c0_29 = arith.constant 0 : index
    %32 = vector.load %arg10[%c0_28, %c0_29] : memref<32x16xf32, #tpu.memory_space<vmem>>, vector<32x16xf32>
    %cst_30 = arith.constant dense<0.000000e+00> : vector<32x256xf32>
    %33 = tpu.matmul %32, %1, %cst_30 {dimension_numbers = #tpu.dot_dimension_numbers<[1], [0], [0], [1], [0, 0, 1, 1], [], []>} : vector<32x16xf32>, vector<16x256xf32>, vector<32x256xf32> -> vector<32x256xf32>
    %c0_31 = arith.constant 0 : index
    %c0_32 = arith.constant 0 : index
    %34 = vector.load %arg11[%c0_31, %c0_32] : memref<32x1xf32, #tpu.memory_space<vmem>>, vector<32x1xf32>
    %35 = vector.broadcast %34 : vector<32x1xf32> to vector<32x256xf32>
    %36 = arith.addf %33, %35 : vector<32x256xf32>
    %cst_33 = arith.constant 0.000000e+00 : f32
    %37 = vector.broadcast %cst_33 : f32 to vector<32x256xf32>
    %38 = arith.maximumf %36, %37 : vector<32x256xf32>
    %c0_34 = arith.constant 0 : index
    %c0_35 = arith.constant 0 : index
    %39 = vector.load %arg12[%c0_34, %c0_35] : memref<32x32xf32, #tpu.memory_space<vmem>>, vector<32x32xf32>
    %cst_36 = arith.constant dense<0.000000e+00> : vector<32x256xf32>
    %40 = tpu.matmul %39, %38, %cst_36 {dimension_numbers = #tpu.dot_dimension_numbers<[1], [0], [0], [1], [0, 0, 1, 1], [], []>} : vector<32x32xf32>, vector<32x256xf32>, vector<32x256xf32> -> vector<32x256xf32>
    %c0_37 = arith.constant 0 : index
    %c0_38 = arith.constant 0 : index
    %41 = vector.load %arg13[%c0_37, %c0_38] : memref<32x1xf32, #tpu.memory_space<vmem>>, vector<32x1xf32>
    %42 = vector.broadcast %41 : vector<32x1xf32> to vector<32x256xf32>
    %43 = arith.addf %40, %42 : vector<32x256xf32>
    %cst_39 = arith.constant 0.000000e+00 : f32
    %44 = vector.broadcast %cst_39 : f32 to vector<32x256xf32>
    %45 = arith.maximumf %43, %44 : vector<32x256xf32>
    %c0_40 = arith.constant 0 : index
    %c0_41 = arith.constant 0 : index
    %46 = vector.load %arg14[%c0_40, %c0_41] : memref<128x32xf32, #tpu.memory_space<vmem>>, vector<128x32xf32>
    %cst_42 = arith.constant dense<0.000000e+00> : vector<128x256xf32>
    %47 = tpu.matmul %46, %45, %cst_42 {dimension_numbers = #tpu.dot_dimension_numbers<[1], [0], [0], [1], [0, 0, 1, 1], [], []>} : vector<128x32xf32>, vector<32x256xf32>, vector<128x256xf32> -> vector<128x256xf32>
    %c0_43 = arith.constant 0 : index
    %c0_44 = arith.constant 0 : index
    %48 = vector.load %arg15[%c0_43, %c0_44] : memref<128x1xf32, #tpu.memory_space<vmem>>, vector<128x1xf32>
    %49 = vector.broadcast %48 : vector<128x1xf32> to vector<128x256xf32>
    %50 = arith.addf %47, %49 : vector<128x256xf32>
    %51 = tpu.iota {dimensions = array<i32: 0>} : vector<256x16xi32>
    %52 = tpu.iota {dimensions = array<i32: 1>} : vector<256x16xi32>
    %c16_i32 = arith.constant 16 : i32
    %53 = vector.broadcast %c16_i32 : i32 to vector<256x16xi32>
    %54 = arith.muli %52, %53 : vector<256x16xi32>
    %55 = arith.cmpi sge, %51, %54 : vector<256x16xi32>
    %c16_i32_45 = arith.constant 16 : i32
    %56 = vector.broadcast %c16_i32_45 : i32 to vector<256x16xi32>
    %57 = arith.addi %54, %56 : vector<256x16xi32>
    %58 = arith.cmpi slt, %51, %57 : vector<256x16xi32>
    %59 = arith.andi %55, %58 : vector<256x16xi1>
    %60 = arith.extui %59 : vector<256x16xi1> to vector<256x16xi32>
    %61 = arith.sitofp %60 : vector<256x16xi32> to vector<256x16xf32>
    %62 = tpu.iota {dimensions = array<i32: 1>} : vector<16x256xi32>
    %63 = tpu.iota {dimensions = array<i32: 0>} : vector<16x256xi32>
    %c16_i32_46 = arith.constant 16 : i32
    %64 = vector.broadcast %c16_i32_46 : i32 to vector<16x256xi32>
    %65 = arith.muli %63, %64 : vector<16x256xi32>
    %66 = arith.cmpi sge, %62, %65 : vector<16x256xi32>
    %c16_i32_47 = arith.constant 16 : i32
    %67 = vector.broadcast %c16_i32_47 : i32 to vector<16x256xi32>
    %68 = arith.addi %65, %67 : vector<16x256xi32>
    %69 = arith.cmpi slt, %62, %68 : vector<16x256xi32>
    %70 = arith.andi %66, %69 : vector<16x256xi1>
    %71 = arith.extui %70 : vector<16x256xi1> to vector<16x256xi32>
    %72 = arith.sitofp %71 : vector<16x256xi32> to vector<16x256xf32>
    %73 = arith.mulf %50, %50 : vector<128x256xf32>
    %cst_48 = arith.constant dense<0.000000e+00> : vector<128x16xf32>
    %74 = tpu.matmul %73, %61, %cst_48 {dimension_numbers = #tpu.dot_dimension_numbers<[1], [0], [0], [1], [0, 0, 1, 1], [], []>} : vector<128x256xf32>, vector<256x16xf32>, vector<128x16xf32> -> vector<128x16xf32>
    %75 = math.sqrt %74 : vector<128x16xf32>
    %cst_49 = arith.constant 9.99999996E-13 : f32
    %76 = vector.broadcast %cst_49 : f32 to vector<128x16xf32>
    %77 = arith.maximumf %75, %76 : vector<128x16xf32>
    %cst_50 = arith.constant 1.000000e+00 : f32
    %78 = vector.broadcast %cst_50 : f32 to vector<128x16xf32>
    %79 = arith.divf %78, %77 : vector<128x16xf32>
    %cst_51 = arith.constant dense<0.000000e+00> : vector<128x256xf32>
    %80 = tpu.matmul %79, %72, %cst_51 {dimension_numbers = #tpu.dot_dimension_numbers<[1], [0], [0], [1], [0, 0, 1, 1], [], []>} : vector<128x16xf32>, vector<16x256xf32>, vector<128x256xf32> -> vector<128x256xf32>
    %81 = arith.mulf %50, %80 : vector<128x256xf32>
    %82 = vector.extract_strided_slice %22 {offsets = [0, 0], sizes = [8, 32], strides = [1, 1]} : vector<16x32xf32> to vector<8x32xf32>
    %83 = vector.extract_strided_slice %81 {offsets = [0, 0], sizes = [32, 256], strides = [1, 1]} : vector<128x256xf32> to vector<32x256xf32>
    %cst_52 = arith.constant dense<0.000000e+00> : vector<8x256xf32>
    %84 = tpu.matmul %82, %83, %cst_52 {dimension_numbers = #tpu.dot_dimension_numbers<[1], [0], [0], [1], [0, 0, 1, 1], [], []>} : vector<8x32xf32>, vector<32x256xf32>, vector<8x256xf32> -> vector<8x256xf32>
    %c0_53 = arith.constant 0 : index
    %c0_54 = arith.constant 0 : index
    %c0_55 = arith.constant 0 : index
    %c0_56 = arith.constant 0 : index
    %85 = vector.load %arg18[%c0_53, %c0_54, %c0_55, %c0_56] : memref<1x4x8x256xf32, #tpu.memory_space<vmem>>, vector<1x1x8x256xf32>
    %86 = vector.shape_cast %85 : vector<1x1x8x256xf32> to vector<8x256xf32>
    %87 = vector.shape_cast %84 : vector<8x256xf32> to vector<1x1x8x256xf32>
    tpu.vector_store %arg18[%c0_53, %c0_54, %c0_55, %c0_56], %87 {strides = array<i32>} : memref<1x4x8x256xf32, #tpu.memory_space<vmem>>, vector<1x1x8x256xf32>,
    %88 = vector.extract_strided_slice %81 {offsets = [32, 0], sizes = [32, 256], strides = [1, 1]} : vector<128x256xf32> to vector<32x256xf32>
    %cst_57 = arith.constant dense<0.000000e+00> : vector<8x256xf32>
    %89 = tpu.matmul %82, %88, %cst_57 {dimension_numbers = #tpu.dot_dimension_numbers<[1], [0], [0], [1], [0, 0, 1, 1], [], []>} : vector<8x32xf32>, vector<32x256xf32>, vector<8x256xf32> -> vector<8x256xf32>
    %c0_58 = arith.constant 0 : index
    %c1 = arith.constant 1 : index
    %c0_59 = arith.constant 0 : index
    %c0_60 = arith.constant 0 : index
    %90 = vector.load %arg18[%c0_58, %c1, %c0_59, %c0_60] : memref<1x4x8x256xf32, #tpu.memory_space<vmem>>, vector<1x1x8x256xf32>
    %91 = vector.shape_cast %90 : vector<1x1x8x256xf32> to vector<8x256xf32>
    %92 = vector.shape_cast %89 : vector<8x256xf32> to vector<1x1x8x256xf32>
    tpu.vector_store %arg18[%c0_58, %c1, %c0_59, %c0_60], %92 {strides = array<i32>} : memref<1x4x8x256xf32, #tpu.memory_space<vmem>>, vector<1x1x8x256xf32>,
    %93 = vector.extract_strided_slice %81 {offsets = [64, 0], sizes = [32, 256], strides = [1, 1]} : vector<128x256xf32> to vector<32x256xf32>
    %cst_61 = arith.constant dense<0.000000e+00> : vector<8x256xf32>
    %94 = tpu.matmul %82, %93, %cst_61 {dimension_numbers = #tpu.dot_dimension_numbers<[1], [0], [0], [1], [0, 0, 1, 1], [], []>} : vector<8x32xf32>, vector<32x256xf32>, vector<8x256xf32> -> vector<8x256xf32>
    %c0_62 = arith.constant 0 : index
    %c2 = arith.constant 2 : index
    %c0_63 = arith.constant 0 : index
    %c0_64 = arith.constant 0 : index
    %95 = vector.load %arg18[%c0_62, %c2, %c0_63, %c0_64] : memref<1x4x8x256xf32, #tpu.memory_space<vmem>>, vector<1x1x8x256xf32>
    %96 = vector.shape_cast %95 : vector<1x1x8x256xf32> to vector<8x256xf32>
    %97 = vector.shape_cast %94 : vector<8x256xf32> to vector<1x1x8x256xf32>
    tpu.vector_store %arg18[%c0_62, %c2, %c0_63, %c0_64], %97 {strides = array<i32>} : memref<1x4x8x256xf32, #tpu.memory_space<vmem>>, vector<1x1x8x256xf32>,
    %98 = vector.extract_strided_slice %81 {offsets = [96, 0], sizes = [32, 256], strides = [1, 1]} : vector<128x256xf32> to vector<32x256xf32>
    %cst_65 = arith.constant dense<0.000000e+00> : vector<8x256xf32>
    %99 = tpu.matmul %82, %98, %cst_65 {dimension_numbers = #tpu.dot_dimension_numbers<[1], [0], [0], [1], [0, 0, 1, 1], [], []>} : vector<8x32xf32>, vector<32x256xf32>, vector<8x256xf32> -> vector<8x256xf32>
    %c0_66 = arith.constant 0 : index
    %c3 = arith.constant 3 : index
    %c0_67 = arith.constant 0 : index
    %c0_68 = arith.constant 0 : index
    %100 = vector.load %arg18[%c0_66, %c3, %c0_67, %c0_68] : memref<1x4x8x256xf32, #tpu.memory_space<vmem>>, vector<1x1x8x256xf32>
    %101 = vector.shape_cast %100 : vector<1x1x8x256xf32> to vector<8x256xf32>
    %102 = vector.shape_cast %99 : vector<8x256xf32> to vector<1x1x8x256xf32>
    tpu.vector_store %arg18[%c0_66, %c3, %c0_67, %c0_68], %102 {strides = array<i32>} : memref<1x4x8x256xf32, #tpu.memory_space<vmem>>, vector<1x1x8x256xf32>,
    return
  }
  func.func @transform_0(%arg0: i32, %arg1: i32) -> (i32, i32, i32) {
    %c0_i32 = arith.constant 0 : i32
    %c0_i32_0 = arith.constant 0 : i32
    return %arg0, %c0_i32, %arg1 : i32, i32, i32
  }
  func.func @transform_1(%arg0: i32, %arg1: i32) -> (i32, i32, i32) {
    %c0_i32 = arith.constant 0 : i32
    %c0_i32_0 = arith.constant 0 : i32
    %c0_i32_1 = arith.constant 0 : i32
    return %arg0, %c0_i32, %c0_i32_0 : i32, i32, i32
  }
  func.func @transform_2(%arg0: i32, %arg1: i32) -> (i32, i32) {
    %c0_i32 = arith.constant 0 : i32
    %c0_i32_0 = arith.constant 0 : i32
    %c0_i32_1 = arith.constant 0 : i32
    return %c0_i32, %c0_i32_0 : i32, i32
  }
  func.func @transform_3(%arg0: i32, %arg1: i32) -> (i32, i32) {
    %c0_i32 = arith.constant 0 : i32
    %c0_i32_0 = arith.constant 0 : i32
    %c0_i32_1 = arith.constant 0 : i32
    return %c0_i32, %c0_i32_0 : i32, i32
  }
  func.func @transform_4(%arg0: i32, %arg1: i32) -> (i32, i32) {
    %c0_i32 = arith.constant 0 : i32
    %c0_i32_0 = arith.constant 0 : i32
    %c0_i32_1 = arith.constant 0 : i32
    return %c0_i32, %c0_i32_0 : i32, i32
  }
  func.func @transform_5(%arg0: i32, %arg1: i32) -> (i32, i32) {
    %c0_i32 = arith.constant 0 : i32
    %c0_i32_0 = arith.constant 0 : i32
    %c0_i32_1 = arith.constant 0 : i32
    return %c0_i32, %c0_i32_0 : i32, i32
  }
  func.func @transform_6(%arg0: i32, %arg1: i32) -> (i32, i32) {
    %c0_i32 = arith.constant 0 : i32
    %c0_i32_0 = arith.constant 0 : i32
    %c0_i32_1 = arith.constant 0 : i32
    return %c0_i32, %c0_i32_0 : i32, i32
  }
  func.func @transform_7(%arg0: i32, %arg1: i32) -> (i32, i32) {
    %c0_i32 = arith.constant 0 : i32
    %c0_i32_0 = arith.constant 0 : i32
    %c0_i32_1 = arith.constant 0 : i32
    return %c0_i32, %c0_i32_0 : i32, i32
  }
  func.func @transform_8(%arg0: i32, %arg1: i32) -> (i32, i32) {
    %c0_i32 = arith.constant 0 : i32
    %c0_i32_0 = arith.constant 0 : i32
    %c0_i32_1 = arith.constant 0 : i32
    return %c0_i32, %c0_i32_0 : i32, i32
  }
  func.func @transform_9(%arg0: i32, %arg1: i32) -> (i32, i32) {
    %c0_i32 = arith.constant 0 : i32
    %c0_i32_0 = arith.constant 0 : i32
    %c0_i32_1 = arith.constant 0 : i32
    return %c0_i32, %c0_i32_0 : i32, i32
  }
  func.func @transform_10(%arg0: i32, %arg1: i32) -> (i32, i32) {
    %c0_i32 = arith.constant 0 : i32
    %c0_i32_0 = arith.constant 0 : i32
    %c0_i32_1 = arith.constant 0 : i32
    return %c0_i32, %c0_i32_0 : i32, i32
  }
  func.func @transform_11(%arg0: i32, %arg1: i32) -> (i32, i32) {
    %c0_i32 = arith.constant 0 : i32
    %c0_i32_0 = arith.constant 0 : i32
    %c0_i32_1 = arith.constant 0 : i32
    return %c0_i32, %c0_i32_0 : i32, i32
  }
  func.func @transform_12(%arg0: i32, %arg1: i32) -> (i32, i32) {
    %c0_i32 = arith.constant 0 : i32
    %c0_i32_0 = arith.constant 0 : i32
    %c0_i32_1 = arith.constant 0 : i32
    return %c0_i32, %c0_i32_0 : i32, i32
  }
  func.func @transform_13(%arg0: i32, %arg1: i32) -> (i32, i32) {
    %c0_i32 = arith.constant 0 : i32
    %c0_i32_0 = arith.constant 0 : i32
    %c0_i32_1 = arith.constant 0 : i32
    return %c0_i32, %c0_i32_0 : i32, i32
  }
  func.func @transform_14(%arg0: i32, %arg1: i32) -> (i32, i32, i32) {
    %c0_i32 = arith.constant 0 : i32
    %c0_i32_0 = arith.constant 0 : i32
    return %arg0, %c0_i32, %arg1 : i32, i32, i32
  }
  func.func @transform_15(%arg0: i32, %arg1: i32) -> (i32, i32, i32) {
    %c0_i32 = arith.constant 0 : i32
    %c0_i32_0 = arith.constant 0 : i32
    return %arg0, %c0_i32, %arg1 : i32, i32, i32
  }
  func.func @transform_16(%arg0: i32, %arg1: i32) -> (i32, i32, i32, i32) {
    %c0_i32 = arith.constant 0 : i32
    %c0_i32_0 = arith.constant 0 : i32
    %c0_i32_1 = arith.constant 0 : i32
    return %arg0, %c0_i32, %c0_i32_0, %arg1 : i32, i32, i32, i32
  }
}

</mosaic_0001>

<bundles_post_ra>
// kernel: mlp_mask_decoder_forward.1
= control target key start
LH: loop header
LB: loop body
LE: loop exit
PB: predicated region body
PF: predicated region fallthrough
CT: control target
= control target key end

     0   :  { %s3579_s21 = smov 0   ;;  %s3581_s22 = smov 0   ;;  %s4326_s0 = inlined_call_operand.vmem [shape: f32[2,16,256], index: 0, kind: input, shape index: {}]   ;;  %s4327_s1 = inlined_call_operand.vmem [shape: f32[2,16,32], index: 1, kind: input, shape index: {}]   ;;  %s4328_s2 = inlined_call_operand.vmem [shape: f32[32,16], index: 2, kind: input, shape index: {}]   ;;  %s4329_s3 = inlined_call_operand.vmem [shape: f32[32,1], index: 3, kind: input, shape index: {}]   ;;  %s4330_s4 = inlined_call_operand.vmem [shape: f32[32,32], index: 4, kind: input, shape index: {}]   ;;  %s4331_s5 = inlined_call_operand.vmem [shape: f32[32,1], index: 5, kind: input, shape index: {}]   ;;  %s4332_s6 = inlined_call_operand.vmem [shape: f32[32,32], index: 6, kind: input, shape index: {}]   ;;  %s4333_s7 = inlined_call_operand.vmem [shape: f32[32,1], index: 7, kind: input, shape index: {}]   ;;  %s4334_s8 = inlined_call_operand.vmem [shape: f32[32,16], index: 8, kind: input, shape index: {}]   ;;  %s4335_s9 = inlined_call_operand.vmem [shape: f32[32,1], index: 9, kind: input, shape index: {}]   ;;  %s4336_s10 = inlined_call_operand.vmem [shape: f32[32,32], index: 10, kind: input, shape index: {}]   ;;  %s4337_s11 = inlined_call_operand.vmem [shape: f32[32,1], index: 11, kind: input, shape index: {}]   ;;  %s4338_s12 = inlined_call_operand.vmem [shape: f32[128,32], index: 12, kind: input, shape index: {}]   ;;  %s4339_s13 = inlined_call_operand.vmem [shape: f32[128,1], index: 13, kind: input, shape index: {}]   ;;  %s4340_s14 = inlined_call_operand.vmem [shape: f32[2,8,256], index: 14, kind: output, shape index: {0}]   ;;  %s4341_s15 = inlined_call_operand.vmem [shape: f32[2,8,256], index: 15, kind: output, shape index: {1}]   ;;  %s4342_s16 = inlined_call_operand.vmem [shape: f32[2,4,8,256], index: 16, kind: output, shape index: {2}]  }
   0x1   :  { %4345 = sst [smem:[#allocation2_spill]] %s4326_s0  ;;  %s3583_s23 = smov 0  }
   0x2 LB: > { %s39_s24 = sadd.s32 1, %s3485_s22  ;;  %p3019_p0 = scmp.ge.s32.totalorder %s3489_s23, 1  ;;  %s3489_s23 = sphi %s3583_s23, %s27_s23   ;;  %s3485_s22 = sphi %s3581_s22, %s4384_s22   ;;  %s3481_s21 = sphi %s3579_s21, %s4383_s21  }
   0x3   : > { %p41_p1 = scmp.ge.s32.totalorder %s39_s24, 2  ;;  %p502_p2 = scmp.lt.s32.totalorder %s3489_s23, 3 }
   0x5   : > { %s4386_s24 = smov (%p41_p1, %s39_s24), 0  ;;  %p503_p3 = pnand %p3019_p0, %p502_p2 }
   0x6   : > { %p584_p4 = scmp.lt.s32.totalorder (!%p503_p3), %s3481_s21, 1  ;;  %v3491_v0 = vmov (!%p503_p3), 0.0   ;;  %v636_v1 = vld [vmem:[%s4329_s3] sm:$0xff] (!%p503_p3)  ;;  %v638_v2 = vld [vmem:[%s4329_s3 + $0x10] sm:$0xff] (!%p503_p3)  ;;  %v3492_v3 = vmov (!%p503_p3), 0   ;;  %v637_v4 = vld [vmem:[%s4329_s3 + $0x8] sm:$0xff] (!%p503_p3) }
   0x7   : > { %506 = sbr.rel (%p503_p3) target bundleno = 2157 (0x86d), region = 76  ;;  %737 = vmatprep.mubr.f32.mxu0 (!%p503_p3), %v3491_v0  ;;  %887 = vmatprep.mubr.f32.mxu1 (!%p503_p3), %v3491_v0  ;;  %v639_v5 = vld [vmem:[%s4329_s3 + $0x18] sm:$0xff] (!%p503_p3)  ;;  %s4346_s25 = sld [smem:[#allocation2_spill]] (!%p503_p3)  ;;  %v774_v12 = vld [vmem:[%s4331_s5] sm:$0xff] (!%p503_p3)  ;;  %v775_v13 = vld [vmem:[%s4331_s5 + $0x8] sm:$0xff] (!%p503_p3)  ;;  %vm4343_vm0 = vcmask (!%p503_p3), 130048  }
   0x8   : > { %3400 = vset.pattern.permute.xlu0 (!%p503_p3), %v3492_v3  ;;  %3401 = vset.pattern.permute.xlu1 (!%p503_p3), %v3492_v3  ;;  %v632_v14 = vld [vmem:[%s4328_s2] sm:$0xff] (!%p503_p3)  ;;  %v776_v15 = vld [vmem:[%s4331_s5 + $0x10] sm:$0xff] (!%p503_p3)  ;;  %v777_v16 = vld [vmem:[%s4331_s5 + $0x18] sm:$0xff] (!%p503_p3)  ;;  %vm4344_vm1 = vcmask (!%p503_p3), 261120  }
   0x9   : > { %642 = vperm.xlu0 (!%p503_p3), %3400, %v636_v1   ;;  %652 = vperm.xlu1 (!%p503_p3), %3401, %v638_v2   ;;  %v633_v17 = vld [vmem:[%s4328_s2 + $0x8] sm:$0xff] (!%p503_p3)  ;;  %v912_v18 = vld [vmem:[%s4333_s7] sm:$0xff] (!%p503_p3)  ;;  %v634_v20 = vld [vmem:[%s4328_s2 + $0x10] sm:$0xff] (!%p503_p3) }
   0xa   : > { %v913_v19 = vld [vmem:[%s4333_s7 + $0x8] sm:$0xff] (!%p503_p3)  ;;  %v914_v21 = vld [vmem:[%s4333_s7 + $0x10] sm:$0xff] (!%p503_p3)  ;;  %v915_v22 = vld [vmem:[%s4333_s7 + $0x18] sm:$0xff] (!%p503_p3) }
   0xb   : > { %v635_v23 = vld [vmem:[%s4328_s2 + $0x18] sm:$0xff] (!%p503_p3)  ;;  %v1130_v24 = vld [vmem:[%s4335_s9] sm:$0xff] (!%p503_p3)  ;;  %v1131_v25 = vld [vmem:[%s4335_s9 + $0x8] sm:$0xff] (!%p503_p3) }
   0xc   : > { %v1132_v26 = vld [vmem:[%s4335_s9 + $0x10] sm:$0xff] (!%p503_p3)  ;;  %v1133_v27 = vld [vmem:[%s4335_s9 + $0x18] sm:$0xff] (!%p503_p3)  ;;  %v1267_v28 = vld [vmem:[%s4337_s11] sm:$0xff] (!%p503_p3) }
   0xd   : > { %647 = vperm.xlu0 (!%p503_p3), %3400, %v637_v4   ;;  %657 = vperm.xlu1 (!%p503_p3), %3401, %v639_v5   ;;  %v1268_v29 = vld [vmem:[%s4337_s11 + $0x8] sm:$0xff] (!%p503_p3)  ;;  %v1269_v30 = vld [vmem:[%s4337_s11 + $0x10] sm:$0xff] (!%p503_p3)  ;;  %v1270_v31 = vld [vmem:[%s4337_s11 + $0x18] sm:$0xff] (!%p503_p3) }
   0xe   : > { %s4388_s21 = smov (!%p584_p4, %s3481_s21), 1  ;;  %v1416_v32 = vld [vmem:[%s4339_s13] sm:$0xff]  ;;  %v1417_v33 = vld [vmem:[%s4339_s13 + $0x8] sm:$0xff]  ;;  %v1418_v34 = vld [vmem:[%s4339_s13 + $0x10] sm:$0xff] }
   0xf   : > { %s3168_s29 = sshll.u32 %s4388_s21, 5  ;;  %v1419_v35 = vld [vmem:[%s4339_s13 + $0x18] sm:$0xff]  ;;  %v1420_v36 = vld [vmem:[%s4339_s13 + $0x20] sm:$0xff]  ;;  %v1421_v37 = vld [vmem:[%s4339_s13 + $0x28] sm:$0xff]  ;;  %s3780_s27 = sshll.u32 %s4388_s21, 4 }
  0x10   : > { %s591_s26 = scalar_lea.vmem %s4346_s25, %s3168_s29  ;;  %v1422_v38 = vld [vmem:[%s4339_s13 + $0x30] sm:$0xff]  ;;  %v1423_v39 = vld [vmem:[%s4339_s13 + $0x38] sm:$0xff]  ;;  %v1424_v40 = vld [vmem:[%s4339_s13 + $0x40] sm:$0xff]  ;;  %s3786_s0 = scalar_lea.vmem %s4327_s1, %s3780_s27 }
  0x11   : > { %v629_v6 = vld [vmem:[%s591_s26 + $0x8] sm:$0xff]  ;;  %v631_v7 = vld [vmem:[%s591_s26 + $0x18] sm:$0xff]  ;;  %v628_v8 = vld [vmem:[%s591_s26] sm:$0xff]  ;;  %780 = vperm.xlu0 %3400, %v774_v12   ;;  %785 = vperm.xlu1 %3401, %v775_v13   ;;  %s606_s17 = scalar_lea.vmem %s4340_s14, %s3780_s27  ;;  %s616_s20 = scalar_lea.vmem %s4341_s15, %s3780_s27 }
  0x12   : > { %v3617_v9 = vpack.c.bf16 %v631_v7, %v629_v6  ;;  %v630_v10 = vld [vmem:[%s591_s26 + $0x10] sm:$0xff]  ;;  %v1425_v41 = vld [vmem:[%s4339_s13 + $0x48] sm:$0xff]  ;;  %v1427_v43 = vld [vmem:[%s4339_s13 + $0x58] sm:$0xff] }
  0x13   : > { %v3619_v11 = vpack.c.bf16 %v630_v10, %v628_v8  ;;  %v1426_v42 = vld [vmem:[%s4339_s13 + $0x50] sm:$0xff]  ;;  %v1428_v44 = vld [vmem:[%s4339_s13 + $0x60] sm:$0xff]  ;;  %v1429_v45 = vld [vmem:[%s4339_s13 + $0x68] sm:$0xff] }
  0x14   : > { %3254 = vmatprep.subr.bf16.mxu0 %v3617_v9  ;;  %v1430_v46 = vld [vmem:[%s4339_s13 + $0x70] sm:$0xff]  ;;  %v1431_v47 = vld [vmem:[%s4339_s13 + $0x78] sm:$0xff] }
  0x15   : > { %3256 = vmatpush1.bf16.msra.mxu0 %v3619_v11  ;;  %790 = vperm.xlu0 %3400, %v776_v15  }
  0x16   : > { %795 = vperm.xlu1 %3401, %v777_v16  }
  0x18   : > { %3030 = vmatmul.mubr.msk.f32.vlgmr.msra.gmra.mrb[0].mxu0 %vm4343_vm0, %v632_v14 }
  0x19   : > { %743 = vmatprep.mubr.f32.mxu0 %v3491_v0  ;;  %918 = vperm.xlu0 %3400, %v912_v18  }
  0x1a   : > { %923 = vperm.xlu1 %3401, %v913_v19   ;;  %v770_v19 = vld [vmem:[%s4330_s4] sm:$0xff] }
  0x1c   : > { %3031 = vmatmul.mubr.msk.f32.gmra.mrb[2].mxu0 %vm4343_vm0, %v633_v17 }
  0x1d   : > { %749 = vmatprep.mubr.f32.mxu0 %v3491_v0  ;;  %928 = vperm.xlu0 %3400, %v914_v21   ;;  %v771_v21 = vld [vmem:[%s4330_s4 + $0x8] sm:$0xff] }
  0x1e   : > { %933 = vperm.xlu1 %3401, %v915_v22   ;;  %v773_v22 = vld [vmem:[%s4330_s4 + $0x18] sm:$0xff] }
  0x20   : > { %3032 = vmatmul.mubr.msk.f32.gmra.mrb[4].mxu0 %vm4343_vm0, %v634_v20  ;;  %v772_v20 = vld [vmem:[%s4330_s4 + $0x10] sm:$0xff] }
  0x21   : > { %755 = vmatprep.mubr.f32.mxu0 %v3491_v0  ;;  %1136 = vperm.xlu0 %3400, %v1130_v24  }
  0x22   : > { %1141 = vperm.xlu1 %3401, %v1131_v25  }
  0x24   : > { %3033 = vmatmul.mubr.msk.f32.gmra.mrb[6].mxu0 %vm4343_vm0, %v635_v23 }
  0x25   : > { %875 = vmatprep.mubr.f32.mxu0 %v3491_v0  ;;  %1146 = vperm.xlu0 %3400, %v1132_v26  }
  0x26   : > { %1151 = vperm.xlu1 %3401, %v1133_v27  }
  0x29   : > { %1273 = vperm.xlu0 %3400, %v1267_v28  }
  0x2a   : > { %1278 = vperm.xlu1 %3401, %v1268_v29  }
  0x2d   : > { %1283 = vperm.xlu0 %3400, %v1269_v30  }
  0x2e   : > { %1288 = vperm.xlu1 %3401, %v1270_v31  }
  0x31   : > { %1434 = vperm.xlu0 %3400, %v1416_v32  }
  0x32   : > { %1439 = vperm.xlu1 %3401, %v1417_v33  }
  0x35   : > { %1444 = vperm.xlu0 %3400, %v1418_v34  }
  0x36   : > { %1449 = vperm.xlu1 %3401, %v1419_v35  }
  0x39   : > { %1454 = vperm.xlu0 %3400, %v1420_v36  }
  0x3a   : > { %1459 = vperm.xlu1 %3401, %v1421_v37  }
  0x3d   : > { %1464 = vperm.xlu0 %3400, %v1422_v38  }
  0x3e   : > { %1469 = vperm.xlu1 %3401, %v1423_v39  }
  0x41   : > { %1474 = vperm.xlu0 %3400, %v1424_v40  }
  0x42   : > { %1479 = vperm.xlu1 %3401, %v1425_v41  }
  0x45   : > { %1484 = vperm.xlu0 %3400, %v1426_v42  }
  0x46   : > { %1489 = vperm.xlu1 %3401, %v1427_v43  }
  0x49   : > { %1494 = vperm.xlu0 %3400, %v1428_v44  }
  0x4a   : > { %1499 = vperm.xlu1 %3401, %v1429_v45  }
  0x4d   : > { %1504 = vperm.xlu0 %3400, %v1430_v46  }
  0x4e   : > { %1509 = vperm.xlu1 %3401, %v1431_v47  }
  0x88   : > { %v643_v48 = vpop.permute.xlu0 %642  ;;  %v653_v57 = vpop.permute.xlu1 %652 }
  0x8c   : > { %v648_v52 = vpop.permute.xlu0 %647  ;;  %v658_v5 = vpop.permute.xlu1 %657 }
  0x90   : > { %v781_v23 = vpop.permute.xlu0 %780  ;;  %v786_v24 = vpop.permute.xlu1 %785 }
  0x94   : > { %v791_v29 = vpop.permute.xlu0 %790 }
  0x95   : > { %v796_v30 = vpop.permute.xlu1 %795 }
  0xeb   : > { %v739_v49 = vpop.f32.mrb[0].mxu0 }
  0xec   : > { %v741_v50 = vpop.f32.mrb[1].mxu0  ;;  %v740_v51 = vadd.f32 %v739_v49, %v643_v48 }
  0xed   : > { %v742_v53 = vadd.f32 %v741_v50, %v643_v48 }
  0xee   : > { %v762_v59 = vmax.f32 %v740_v51, 0.0 }
  0xef   : > { %v745_v54 = vpop.f32.mrb[2].mxu0  ;;  %v763_v61 = vmax.f32 %v742_v53, 0.0 }
  0xf0   : > { %v746_v55 = vadd.f32 %v745_v54, %v648_v52  ;;  %v747_v56 = vpop.f32.mrb[3].mxu0 }
  0xf1   : > { %v748_v58 = vadd.f32 %v747_v56, %v648_v52  ;;  %v909_v56 = vld [vmem:[%s4332_s6 + $0x8] sm:$0xff] }
  0xf2   : > { %v764_v60 = vmax.f32 %v746_v55, 0.0  ;;  %v908_v55 = vld [vmem:[%s4332_s6] sm:$0xff] }
  0xf3   : > { %v765_v62 = vmax.f32 %v748_v58, 0.0  ;;  %v751_v63 = vpop.f32.mrb[4].mxu0  ;;  %v911_v58 = vld [vmem:[%s4332_s6 + $0x18] sm:$0xff] }
  0xf4   : > { %v3259_v1 = vpack.c.bf16 %v764_v60, %v762_v59  ;;  %v753_v2 = vpop.f32.mrb[5].mxu0  ;;  %v752_v4 = vadd.f32 %v751_v63, %v653_v57 }
  0xf5   : > { %v3257_v3 = vpack.c.bf16 %v765_v62, %v763_v61  ;;  %v754_v6 = vadd.f32 %v753_v2, %v653_v57  ;;  %v910_v57 = vld [vmem:[%s4332_s6 + $0x10] sm:$0xff]  ;;  %v919_v61 = vpop.permute.xlu0 %918  ;;  %v924_v62 = vpop.permute.xlu1 %923 }
  0xf6   : > { %v766_v13 = vmax.f32 %v752_v4, 0.0 }
  0xf7   : > { %v757_v7 = vpop.f32.mrb[6].mxu0  ;;  %3258 = vmatprep.subr.bf16.mxu0 %v3257_v3  ;;  %3369 = vmatprep.subr.bf16.mxu1 %v3257_v3  ;;  %v767_v15 = vmax.f32 %v754_v6, 0.0 }
  0xf8   : > { %v758_v8 = vadd.f32 %v757_v7, %v658_v5  ;;  %v759_v10 = vpop.f32.mrb[7].mxu0  ;;  %3260 = vmatpush1.bf16.msra.mxu0 %v3259_v1  ;;  %3371 = vmatpush1.bf16.msra.mxu1 %v3259_v1 }
  0xf9   : > { %v760_v12 = vadd.f32 %v759_v10, %v658_v5 }
  0xfa   : > { %v768_v14 = vmax.f32 %v758_v8, 0.0 }
  0xfb   : > { %v769_v16 = vmax.f32 %v760_v12, 0.0  ;;  %v929_v12 = vpop.permute.xlu0 %928 }
  0xfc   : > { %v3263_v17 = vpack.c.bf16 %v768_v14, %v766_v13  ;;  %v934_v13 = vpop.permute.xlu1 %933 }
  0xfd   : > { %v3261_v18 = vpack.c.bf16 %v769_v16, %v767_v15 }
  0xff   : > { %3262 = vmatprep.subr.bf16.mxu0 %v3261_v18  ;;  %3370 = vmatprep.subr.bf16.mxu1 %v3261_v18 }
 0x100   : > { %3264 = vmatpush1.bf16.msra.mxu0 %v3263_v17  ;;  %3372 = vmatpush1.bf16.msra.mxu1 %v3263_v17 }
 0x103   : > { %3034 = vmatmul.mubr.msk.f32.vlgmr.msra.gmra.mrb[8].mxu0 %vm4344_vm1, %v770_v19  ;;  %3036 = vmatmul.mubr.msk.f32.vlgmr.msra.gmra.mrb[0].mxu1 %vm4344_vm1, %v772_v20 }
 0x104   : > { %881 = vmatprep.mubr.f32.mxu0 %v3491_v0  ;;  %893 = vmatprep.mubr.f32.mxu1 %v3491_v0 }
 0x107   : > { %3035 = vmatmul.mubr.msk.f32.gmra.mrb[10].mxu0 %vm4344_vm1, %v771_v21  ;;  %3037 = vmatmul.mubr.msk.f32.gmra.mrb[2].mxu1 %vm4344_vm1, %v773_v22  ;;  %v1037_v22 = vld [vmem:[%s3786_s0] sm:$0xff] }
 0x108   : > { %1012 = vmatprep.mubr.f32.mxu0 %v3491_v0  ;;  %1109 = vmatprep.mubr.f32.mxu1 %v3491_v0 }
 0x1d6   : > { %v877_v25 = vpop.f32.mrb[8].mxu0  ;;  %v889_v26 = vpop.f32.mrb[0].mxu1 }
 0x1d7   : > { %v879_v27 = vpop.f32.mrb[9].mxu0  ;;  %v891_v28 = vpop.f32.mrb[1].mxu1  ;;  %v878_v31 = vadd.f32 %v877_v25, %v781_v23  ;;  %v890_v32 = vadd.f32 %v889_v26, %v791_v29  ;;  %v1129_v25 = vld [vmem:[%s4334_s8 + $0x18] sm:$0xff] }
 0x1d8   : > { %v880_v33 = vadd.f32 %v879_v27, %v781_v23  ;;  %v892_v34 = vadd.f32 %v891_v28, %v791_v29  ;;  %v1038_v23 = vld [vmem:[%s3786_s0 + $0x8] sm:$0xff] }
 0x1d9   : > { %v900_v43 = vmax.f32 %v878_v31, 0.0  ;;  %v904_v44 = vmax.f32 %v890_v32, 0.0  ;;  %v1137_v32 = vpop.permute.xlu0 %1136 }
 0x1da   : > { %v883_v35 = vpop.f32.mrb[10].mxu0  ;;  %v895_v36 = vpop.f32.mrb[2].mxu1  ;;  %v901_v47 = vmax.f32 %v880_v33, 0.0  ;;  %v905_v48 = vmax.f32 %v892_v34, 0.0 }
 0x1db   : > { %v884_v37 = vadd.f32 %v883_v35, %v786_v24  ;;  %v896_v38 = vadd.f32 %v895_v36, %v796_v30  ;;  %v885_v39 = vpop.f32.mrb[11].mxu0  ;;  %v897_v40 = vpop.f32.mrb[3].mxu1 }
 0x1dc   : > { %v886_v41 = vadd.f32 %v885_v39, %v786_v24  ;;  %v898_v42 = vadd.f32 %v897_v40, %v796_v30  ;;  %v1126_v24 = vld [vmem:[%s4334_s8] sm:$0xff]  ;;  %v1142_v34 = vpop.permute.xlu1 %1141 }
 0x1dd   : > { %v902_v45 = vmax.f32 %v884_v37, 0.0  ;;  %v906_v46 = vmax.f32 %v896_v38, 0.0 }
 0x1de   : > { %v903_v49 = vmax.f32 %v886_v41, 0.0  ;;  %v907_v50 = vmax.f32 %v898_v42, 0.0 }
 0x1df   : > { %v3267_v51 = vpack.c.bf16 %v902_v45, %v900_v43  ;;  %v3271_v52 = vpack.c.bf16 %v906_v46, %v904_v44 }
 0x1e0   : > { %v3265_v53 = vpack.c.bf16 %v903_v49, %v901_v47  ;;  %v3269_v54 = vpack.c.bf16 %v907_v50, %v905_v48  ;;  %v1147_v47 = vpop.permute.xlu0 %1146  ;;  %v1152_v50 = vpop.permute.xlu1 %1151 }
 0x1e2   : > { %3266 = vmatprep.subr.bf16.mxu0 %v3265_v53 }
 0x1e3   : > { %3268 = vmatpush1.bf16.msra.mxu0 %v3267_v51 }
 0x1e4   : > { %3270 = vmatprep.subr.bf16.mxu0 %v3269_v54 }
 0x1e7   : > { %3272 = vmatpush1.bf16.msra.mxu0 %v3271_v52 }
 0x1ea   : > { %3038 = vmatmul.mubr.msk.f32.vlgmr.msra.gmra.mrb[12].mxu0 %vm4344_vm1, %v908_v55 }
 0x1eb   : > { %1018 = vmatprep.mubr.f32.mxu0 %v3491_v0 }
 0x1ee   : > { %3039 = vmatmul.mubr.msk.f32.gmra.mrb[14].mxu0 %vm4344_vm1, %v909_v56 }
 0x1ef   : > { %1024 = vmatprep.mubr.f32.mxu0 %v3491_v0 }
 0x1f2   : > { %3040 = vmatmul.mubr.msk.f32.gmra.mrb[16].mxu0 %vm4344_vm1, %v910_v57 }
 0x1f3   : > { %1030 = vmatprep.mubr.f32.mxu0 %v3491_v0 }
 0x1f6   : > { %3041 = vmatmul.mubr.msk.f32.gmra.mrb[18].mxu0 %vm4344_vm1, %v911_v58 }
 0x1f7   : > { %1367 = vmatprep.mubr.f32.mxu0 %v3491_v0 }
 0x2bd   : > { %v1014_v59 = vpop.f32.mrb[12].mxu0 }
 0x2be   : > { %v1016_v60 = vpop.f32.mrb[13].mxu0  ;;  %v1015_v1 = vadd.f32 %v1014_v59, %v919_v61 }
 0x2bf   : > { %v1017_v4 = vadd.f32 %v1016_v60, %v919_v61 }
 0x2c1   : > { %v1020_v63 = vpop.f32.mrb[14].mxu0 }
 0x2c2   : > { %v1021_v2 = vadd.f32 %v1020_v63, %v924_v62  ;;  %v1022_v3 = vpop.f32.mrb[15].mxu0  ;;  %v1264_v63 = vld [vmem:[%s4336_s10 + $0x8] sm:$0xff] }
 0x2c3   : > { %v1023_v5 = vadd.f32 %v1022_v3, %v924_v62  ;;  %v1263_v62 = vld [vmem:[%s4336_s10] sm:$0xff]  ;;  %v1721_v3 = vlaneseq }
 0x2c4   : > { %v3275_v6 = vpack.c.bf16 %v1021_v2, %v1015_v1  ;;  %v1265_v1 = vld [vmem:[%s4336_s10 + $0x10] sm:$0xff]  ;;  %v1266_v2 = vld [vmem:[%s4336_s10 + $0x18] sm:$0xff] }
 0x2c5   : > { %v3273_v7 = vpack.c.bf16 %v1023_v5, %v1017_v4  ;;  %v1026_v8 = vpop.f32.mrb[16].mxu0  ;;  %v3843_v4 = vshrl.u32 %v1721_v3, 7  ;;  %v3845_v5 = vand.u32 127, %v1721_v3  ;;  %v1400_v3 = vld [vmem:[%s4338_s12] sm:$0xff] }
 0x2c6   : > { %v1028_v10 = vpop.f32.mrb[17].mxu0  ;;  %v1027_v15 = vadd.f32 %v1026_v8, %v929_v12 }
 0x2c7   : > { %3274 = vmatprep.subr.bf16.mxu1 %v3273_v7  ;;  %v1029_v18 = vadd.f32 %v1028_v10, %v929_v12  ;;  %v1739_v7 = vadd.s32 136, %v3843_v4  ;;  %v3850_v8 = vmul.u32 16, %v3845_v5  ;;  %v3857_v12 = vadd.s32 8, %v3843_v4 }
 0x2c8   : > { %3276 = vmatpush1.bf16.msra.mxu1 %v3275_v6  ;;  %v1738_v6 = vadd.s32 128, %v3843_v4 }
 0x2c9   : > { %v1032_v14 = vpop.f32.mrb[18].mxu0  ;;  %v3854_v10 = vadd.s32 16, %v3850_v8  ;;  %vm1774_vm3 = vcmp.ge.s32.totalorder %v1739_v7, %v3850_v8  ;;  %vm1757_vm7 = vcmp.ge.s32.totalorder %v3843_v4, %v3850_v8  ;;  %vm1758_vm10 = vcmp.ge.s32.totalorder %v3857_v12, %v3850_v8 }
 0x2ca   : > { %v1033_v16 = vadd.f32 %v1032_v14, %v934_v13  ;;  %v1034_v17 = vpop.f32.mrb[19].mxu0  ;;  %vm1773_vm2 = vcmp.ge.s32.totalorder %v1738_v6, %v3850_v8  ;;  %v1741_v14 = vadd.s32 152, %v3843_v4 }
 0x2cb   : > { %v1035_v19 = vadd.f32 %v1034_v17, %v934_v13  ;;  %vm1806_vm4 = vcmp.lt.s32.totalorder %v1738_v6, %v3854_v10  ;;  %vm1807_vm5 = vcmp.lt.s32.totalorder %v1739_v7, %v3854_v10  ;;  %v1740_v13 = vadd.s32 144, %v3843_v4  ;;  %v1401_v6 = vld [vmem:[%s4338_s12 + $0x8] sm:$0xff]  ;;  %v1402_v7 = vld [vmem:[%s4338_s12 + $0x10] sm:$0xff] }
 0x2cc   : > { %v3279_v20 = vpack.c.bf16 %v1033_v16, %v1027_v15  ;;  %vm1838_vm6 = vmand %vm1773_vm2, %vm1806_vm4  ;;  %vm1790_vm8 = vcmp.lt.s32.totalorder %v3843_v4, %v3854_v10  ;;  %vm1791_vm11 = vcmp.lt.s32.totalorder %v3857_v12, %v3854_v10  ;;  %v1724_v15 = vadd.s32 16, %v3843_v4 }
 0x2cd   : > { %v3277_v21 = vpack.c.bf16 %v1035_v19, %v1029_v18  ;;  %vm1839_vm9 = vmand %vm1774_vm3, %vm1807_vm5  ;;  %v3493_v16 = vmov 1.0|1.0   ;;  %vm1775_vm14 = vcmp.ge.s32.totalorder %v1740_v13, %v3850_v8  ;;  %vm1808_vm15 = vcmp.lt.s32.totalorder %v1740_v13, %v3854_v10  ;;  %v1403_v13 = vld [vmem:[%s4338_s12 + $0x18] sm:$0xff] }
 0x2ce   : > { %vm3301_vm12 = vmpackc.low %vm1839_vm9, %vm1838_vm6  ;;  %v1725_v17 = vadd.s32 24, %v3843_v4  ;;  %vm1776_vm3 = vcmp.ge.s32.totalorder %v1741_v14, %v3850_v8  ;;  %vm1809_vm4 = vcmp.lt.s32.totalorder %v1741_v14, %v3854_v10  ;;  %v1742_v18 = vadd.s32 160, %v3843_v4  ;;  %v1404_v14 = vld [vmem:[%s4338_s12 + $0x20] sm:$0xff] }
 0x2cf   : > { %3278 = vmatprep.subr.bf16.mxu1 %v3277_v21  ;;  %vm1822_vm13 = vmand %vm1757_vm7, %vm1790_vm8  ;;  %vm1759_vm9 = vcmp.ge.s32.totalorder %v1724_v15, %v3850_v8  ;;  %vm1792_vm7 = vcmp.lt.s32.totalorder %v1724_v15, %v3854_v10  ;;  %v1743_v19 = vadd.s32 168, %v3843_v4  ;;  %v1727_v21 = vadd.s32 40, %v3843_v4  ;;  %v1405_v15 = vld [vmem:[%s4338_s12 + $0x28] sm:$0xff] }
 0x2d0   : > { %3280 = vmatpush1.bf16.msra.mxu1 %v3279_v20  ;;  %vm1823_vm2 = vmand %vm1758_vm10, %vm1791_vm11  ;;  %vm1793_vm10 = vcmp.lt.s32.totalorder %v1725_v17, %v3854_v10  ;;  %v1726_v20 = vadd.s32 32, %v3843_v4 }
 0x2d1   : > { %3282 = vmatprep.subr.bf16.mxu1 %v3617_v9  ;;  %v1127_v9 = vld [vmem:[%s4334_s8 + $0x8] sm:$0xff]  ;;  %vm3303_vm5 = vmpackc.low %vm1823_vm2, %vm1822_vm13  ;;  %vm1777_vm2 = vcmp.ge.s32.totalorder %v1742_v18, %v3850_v8 }
 0x2d2   : > { %vm1840_vm6 = vmand %vm1775_vm14, %vm1808_vm15  ;;  %vm1810_vm14 = vcmp.lt.s32.totalorder %v1742_v18, %v3854_v10  ;;  %v1407_v18 = vld [vmem:[%s4338_s12 + $0x38] sm:$0xff] }
 0x2d3   : > { %3042 = vmatmul.mubr.msk.f32.vlgmr.msra.gmra.mrb[4].mxu1 %vm4344_vm1, %v1037_v22  ;;  %vm1841_vm8 = vmand %vm1776_vm3, %vm1809_vm4  ;;  %vm1811_vm3 = vcmp.lt.s32.totalorder %v1743_v19, %v3854_v10  ;;  %v1744_v22 = vadd.s32 176, %v3843_v4 }
 0x2d4   : > { %1115 = vmatprep.mubr.f32.mxu1 %v3491_v0  ;;  %3284 = vmatpush1.bf16.msra.mxu1 %v3619_v11  ;;  %v1128_v11 = vld [vmem:[%s4334_s8 + $0x10] sm:$0xff]  ;;  %vm3305_vm11 = vmpackc.low %vm1841_vm8, %vm1840_vm6  ;;  %vm1761_vm8 = vcmp.ge.s32.totalorder %v1726_v20, %v3850_v8 }
 0x2d5   : > { %vm1824_vm13 = vmand %vm1759_vm9, %vm1792_vm7  ;;  %vm1794_vm9 = vcmp.lt.s32.totalorder %v1726_v20, %v3854_v10  ;;  %v1409_v20 = vld [vmem:[%s4338_s12 + $0x48] sm:$0xff] }
 0x2d6   : > { %vm1842_vm6 = vmand %vm1777_vm2, %vm1810_vm14  ;;  %vm1812_vm2 = vcmp.lt.s32.totalorder %v1744_v22, %v3854_v10 }
 0x2d7   : > { %3043 = vmatmul.mubr.msk.f32.gmra.mrb[6].mxu1 %vm4344_vm1, %v1038_v23  ;;  %v1745_v23 = vadd.s32 184, %v3843_v4 }
 0x2d8   : > { %1230 = vmatprep.mubr.f32.mxu1 %v3491_v0 }
 0x2db   : > { %3044 = vmatmul.mubr.msk.f32.vlgmr.msra.gmra.mrb[8].mxu1 %vm4343_vm0, %v1126_v24  ;;  %v1728_v24 = vadd.s32 48, %v3843_v4 }
 0x2dc   : > { %1236 = vmatprep.mubr.f32.mxu1 %v3491_v0 }
 0x2df   : > { %3045 = vmatmul.mubr.msk.f32.gmra.mrb[10].mxu1 %vm4343_vm0, %v1127_v9  ;;  %v1729_v9 = vadd.s32 56, %v3843_v4 }
 0x2e0   : > { %1242 = vmatprep.mubr.f32.mxu1 %v3491_v0 }
 0x2e3   : > { %3046 = vmatmul.mubr.msk.f32.gmra.mrb[12].mxu1 %vm4343_vm0, %v1128_v11  ;;  %v1746_v11 = vadd.s32 192, %v3843_v4 }
 0x2e4   : > { %1248 = vmatprep.mubr.f32.mxu1 %v3491_v0 }
 0x2e7   : > { %3047 = vmatmul.mubr.msk.f32.gmra.mrb[14].mxu1 %vm4343_vm0, %v1129_v25  ;;  %v1747_v25 = vadd.s32 200, %v3843_v4 }
 0x2e8   : > { %1624 = vmatprep.mubr.f32.mxu1 %v3491_v0 }
 0x3a6   : > { %v1111_v26 = vpop.f32.mrb[4].mxu1 }
 0x3a7   : > { %1122 = vst [vmem:[%s606_s17] sm:$0xff] %v1111_v26  ;;  %v1113_v27 = vpop.f32.mrb[5].mxu1  ;;  %v1730_v26 = vadd.s32 64, %v3843_v4 }
 0x3a8   : > { %1123 = vst [vmem:[%s606_s17 + $0x8] sm:$0xff] %v1113_v27  ;;  %v1731_v27 = vadd.s32 72, %v3843_v4 }
 0x3aa   : > { %v1117_v28 = vpop.f32.mrb[6].mxu1 }
 0x3ab   : > { %1124 = vst [vmem:[%s616_s20] sm:$0xff] %v1117_v28  ;;  %v1119_v29 = vpop.f32.mrb[7].mxu1  ;;  %v1748_v28 = vadd.s32 208, %v3843_v4 }
 0x3ac   : > { %1125 = vst [vmem:[%s616_s20 + $0x8] sm:$0xff] %v1119_v29  ;;  %v1749_v29 = vadd.s32 216, %v3843_v4 }
 0x3ae   : > { %v1232_v30 = vpop.f32.mrb[8].mxu1 }
 0x3af   : > { %v1234_v31 = vpop.f32.mrb[9].mxu1  ;;  %v1233_v33 = vadd.f32 %v1232_v30, %v1137_v32  ;;  %v1732_v30 = vadd.s32 80, %v3843_v4 }
 0x3b0   : > { %v1235_v35 = vadd.f32 %v1234_v31, %v1137_v32  ;;  %v1733_v31 = vadd.s32 88, %v3843_v4  ;;  %v1750_v32 = vadd.s32 224, %v3843_v4 }
 0x3b1   : > { %v1255_v40 = vmax.f32 %v1233_v33, 0.0  ;;  %v1751_v33 = vadd.s32 232, %v3843_v4 }
 0x3b2   : > { %v1238_v36 = vpop.f32.mrb[10].mxu1  ;;  %v1256_v42 = vmax.f32 %v1235_v35, 0.0 }
 0x3b3   : > { %v1239_v37 = vadd.f32 %v1238_v36, %v1142_v34  ;;  %v1240_v38 = vpop.f32.mrb[11].mxu1  ;;  %vm1819_vm0 = vcmp.lt.s32.totalorder %v1751_v33, %v3854_v10  ;;  %v1274_v36 = vpop.permute.xlu0 %1273 }
 0x3b4   : > { %v1241_v39 = vadd.f32 %v1240_v38, %v1142_v34  ;;  %v1279_v38 = vpop.permute.xlu1 %1278 }
 0x3b5   : > { %v1257_v41 = vmax.f32 %v1239_v37, 0.0 }
 0x3b6   : > { %v1258_v43 = vmax.f32 %v1241_v39, 0.0  ;;  %v1244_v44 = vpop.f32.mrb[12].mxu1 }
 0x3b7   : > { %v3287_v45 = vpack.c.bf16 %v1257_v41, %v1255_v40  ;;  %v1246_v46 = vpop.f32.mrb[13].mxu1  ;;  %v1245_v49 = vadd.f32 %v1244_v44, %v1147_v47 }
 0x3b8   : > { %v3285_v48 = vpack.c.bf16 %v1258_v43, %v1256_v42  ;;  %v1247_v51 = vadd.f32 %v1246_v46, %v1147_v47 }
 0x3b9   : > { %v1259_v56 = vmax.f32 %v1245_v49, 0.0 }
 0x3ba   : > { %v1250_v52 = vpop.f32.mrb[14].mxu1  ;;  %3286 = vmatprep.subr.bf16.mxu0 %v3285_v48  ;;  %v1260_v58 = vmax.f32 %v1247_v51, 0.0  ;;  %v1284_v51 = vpop.permute.xlu0 %1283 }
 0x3bb   : > { %v1251_v53 = vadd.f32 %v1250_v52, %v1152_v50  ;;  %v1252_v54 = vpop.f32.mrb[15].mxu1  ;;  %3288 = vmatpush1.bf16.msra.mxu0 %v3287_v45 }
 0x3bc   : > { %v1253_v55 = vadd.f32 %v1252_v54, %v1152_v50  ;;  %v1289_v54 = vpop.permute.xlu1 %1288 }
 0x3bd   : > { %v1261_v57 = vmax.f32 %v1251_v53, 0.0 }
 0x3be   : > { %v1262_v59 = vmax.f32 %v1253_v55, 0.0 }
 0x3bf   : > { %v3291_v60 = vpack.c.bf16 %v1261_v57, %v1259_v56 }
 0x3c0   : > { %v3289_v61 = vpack.c.bf16 %v1262_v59, %v1260_v58 }
 0x3c2   : > { %3290 = vmatprep.subr.bf16.mxu0 %v3289_v61 }
 0x3c3   : > { %3292 = vmatpush1.bf16.msra.mxu0 %v3291_v60 }
 0x3c4   : > { %3302 = vmatprep.subr.msk.bf16.mxu0 %vm3301_vm12, %v3493_v16  ;;  %vm1760_vm12 = vcmp.ge.s32.totalorder %v1725_v17, %v3850_v8  ;;  %v1406_v17 = vld [vmem:[%s4338_s12 + $0x30] sm:$0xff] }
 0x3c5   : > { %vm1825_vm15 = vmand %vm1760_vm12, %vm1793_vm10  ;;  %vm1795_vm12 = vcmp.lt.s32.totalorder %v1727_v21, %v3854_v10 }
 0x3c6   : > { %3048 = vmatmul.mubr.msk.f32.vlgmr.msra.gmra.mrb[20].mxu0 %vm4344_vm1, %v1263_v62  ;;  %vm3307_vm4 = vmpackc.low %vm1825_vm15, %vm1824_vm13  ;;  %vm1779_vm15 = vcmp.ge.s32.totalorder %v1744_v22, %v3850_v8  ;;  %v1411_v22 = vld [vmem:[%s4338_s12 + $0x58] sm:$0xff] }
 0x3c7   : > { %1373 = vmatprep.mubr.f32.mxu0 %v3491_v0  ;;  %3304 = vmatpush3.bf16.msk.msra.mxu0 %vm3303_vm5, %v3493_v16  ;;  %vm1778_vm5 = vcmp.ge.s32.totalorder %v1743_v19, %v3850_v8  ;;  %vm1826_vm13 = vmand %vm1761_vm8, %vm1794_vm9  ;;  %vm1796_vm8 = vcmp.lt.s32.totalorder %v1728_v24, %v3854_v10  ;;  %v1408_v19 = vld [vmem:[%s4338_s12 + $0x40] sm:$0xff] }
 0x3c8   : > { %3306 = vmatprep.subr.msk.bf16.mxu0 %vm3305_vm11, %v3493_v16  ;;  %vm1843_vm7 = vmand %vm1778_vm5, %vm1811_vm3  ;;  %vm1762_vm11 = vcmp.ge.s32.totalorder %v1727_v21, %v3850_v8  ;;  %vm1813_vm5 = vcmp.lt.s32.totalorder %v1745_v23, %v3854_v10  ;;  %v1410_v21 = vld [vmem:[%s4338_s12 + $0x50] sm:$0xff] }
 0x3c9   : > { %vm3309_vm10 = vmpackc.low %vm1843_vm7, %vm1842_vm6  ;;  %vm1763_vm7 = vcmp.ge.s32.totalorder %v1728_v24, %v3850_v8  ;;  %v1413_v24 = vld [vmem:[%s4338_s12 + $0x68] sm:$0xff] }
 0x3ca   : > { %3049 = vmatmul.mubr.msk.f32.gmra.mrb[22].mxu0 %vm4344_vm1, %v1264_v63  ;;  %vm1827_vm14 = vmand %vm1762_vm11, %vm1795_vm12  ;;  %vm1797_vm11 = vcmp.lt.s32.totalorder %v1729_v9, %v3854_v10 }
 0x3cb   : > { %1379 = vmatprep.mubr.f32.mxu0 %v3491_v0  ;;  %3308 = vmatpush3.bf16.msk.msra.mxu0 %vm3307_vm4, %v3493_v16  ;;  %vm1780_vm4 = vcmp.ge.s32.totalorder %v1745_v23, %v3850_v8  ;;  %vm3311_vm3 = vmpackc.low %vm1827_vm14, %vm1826_vm13  ;;  %vm1781_vm14 = vcmp.ge.s32.totalorder %v1746_v11, %v3850_v8  ;;  %v1412_v23 = vld [vmem:[%s4338_s12 + $0x60] sm:$0xff] }
 0x3cc   : > { %3310 = vmatprep.subr.msk.bf16.mxu0 %vm3309_vm10, %v3493_v16  ;;  %vm1844_vm6 = vmand %vm1779_vm15, %vm1812_vm2  ;;  %vm1764_vm10 = vcmp.ge.s32.totalorder %v1729_v9, %v3850_v8  ;;  %vm1814_vm15 = vcmp.lt.s32.totalorder %v1746_v11, %v3854_v10  ;;  %v1414_v9 = vld [vmem:[%s4338_s12 + $0x70] sm:$0xff]  ;;  %v1415_v11 = vld [vmem:[%s4338_s12 + $0x78] sm:$0xff] }
 0x3cd   : > { %vm1845_vm9 = vmand %vm1780_vm4, %vm1813_vm5  ;;  %vm1815_vm4 = vcmp.lt.s32.totalorder %v1747_v25, %v3854_v10 }
 0x3ce   : > { %3050 = vmatmul.mubr.msk.f32.gmra.mrb[24].mxu0 %vm4344_vm1, %v1265_v1  ;;  %vm3313_vm12 = vmpackc.low %vm1845_vm9, %vm1844_vm6  ;;  %vm1765_vm9 = vcmp.ge.s32.totalorder %v1730_v26, %v3850_v8 }
 0x3cf   : > { %1385 = vmatprep.mubr.f32.mxu0 %v3491_v0  ;;  %3312 = vmatpush3.bf16.msk.msra.mxu0 %vm3311_vm3, %v3493_v16  ;;  %vm1828_vm13 = vmand %vm1763_vm7, %vm1796_vm8  ;;  %vm1782_vm3 = vcmp.ge.s32.totalorder %v1747_v25, %v3850_v8  ;;  %vm1798_vm7 = vcmp.lt.s32.totalorder %v1730_v26, %v3854_v10  ;;  %v1734_v25 = vadd.s32 96, %v3843_v4  ;;  %v1735_v26 = vadd.s32 104, %v3843_v4 }
 0x3d0   : > { %3314 = vmatprep.subr.msk.bf16.mxu0 %vm3313_vm12, %v3493_v16  ;;  %vm1829_vm2 = vmand %vm1764_vm10, %vm1797_vm11  ;;  %vm1766_vm12 = vcmp.ge.s32.totalorder %v1731_v27, %v3850_v8  ;;  %vm1799_vm10 = vcmp.lt.s32.totalorder %v1731_v27, %v3854_v10  ;;  %v1752_v27 = vadd.s32 240, %v3843_v4 }
 0x3d1   : > { %vm3315_vm5 = vmpackc.low %vm1829_vm2, %vm1828_vm13  ;;  %vm1783_vm2 = vcmp.ge.s32.totalorder %v1748_v28, %v3850_v8 }
 0x3d2   : > { %3051 = vmatmul.mubr.msk.f32.gmra.mrb[26].mxu0 %vm4344_vm1, %v1266_v2  ;;  %vm1846_vm6 = vmand %vm1781_vm14, %vm1814_vm15  ;;  %vm1816_vm14 = vcmp.lt.s32.totalorder %v1748_v28, %v3854_v10  ;;  %v1753_v28 = vadd.s32 248, %v3843_v4 }
 0x3d3   : > { %3316 = vmatpush3.bf16.msk.msra.mxu0 %vm3315_vm5, %v3493_v16  ;;  %vm1847_vm8 = vmand %vm1782_vm3, %vm1815_vm4  ;;  %vm1784_vm5 = vcmp.ge.s32.totalorder %v1749_v29, %v3850_v8  ;;  %vm1817_vm3 = vcmp.lt.s32.totalorder %v1749_v29, %v3854_v10  ;;  %v1736_v29 = vadd.s32 112, %v3843_v4 }
 0x3d4   : > { %vm3317_vm11 = vmpackc.low %vm1847_vm8, %vm1846_vm6  ;;  %vm1767_vm8 = vcmp.ge.s32.totalorder %v1732_v30, %v3850_v8 }
 0x3d5   : > { %3318 = vmatprep.subr.msk.bf16.mxu0 %vm3317_vm11, %v3493_v16  ;;  %vm1830_vm13 = vmand %vm1765_vm9, %vm1798_vm7  ;;  %vm1800_vm9 = vcmp.lt.s32.totalorder %v1732_v30, %v3854_v10  ;;  %vm1768_vm11 = vcmp.ge.s32.totalorder %v1733_v31, %v3850_v8  ;;  %v1737_v30 = vadd.s32 120, %v3843_v4 }
 0x3d6   : > { %vm1831_vm15 = vmand %vm1766_vm12, %vm1799_vm10  ;;  %vm1801_vm12 = vcmp.lt.s32.totalorder %v1733_v31, %v3854_v10  ;;  %v1918_v31 = vadd.s32 128, %v3845_v5 }
 0x3d7   : > { %vm3319_vm4 = vmpackc.low %vm1831_vm15, %vm1830_vm13  ;;  %vm1785_vm15 = vcmp.ge.s32.totalorder %v1750_v32, %v3850_v8 }
 0x3d8   : > { %3320 = vmatpush3.bf16.msk.msra.mxu0 %vm3319_vm4, %v3493_v16  ;;  %vm1848_vm6 = vmand %vm1783_vm2, %vm1816_vm14  ;;  %vm1818_vm4 = vcmp.lt.s32.totalorder %v1750_v32, %v3854_v10  ;;  %vm1786_vm14 = vcmp.ge.s32.totalorder %v1751_v33, %v3850_v8  ;;  %v1919_v32 = vmul.u32 16, %v3843_v4  ;;  %v1920_v33 = vmul.u32 16, %v3857_v12  ;;  %v1435_v4 = vpop.permute.xlu0 %1434 }
 0x3d9   : > { %vm1849_vm7 = vmand %vm1784_vm5, %vm1817_vm3 }
 0x3da   : > { %vm3321_vm10 = vmpackc.low %vm1849_vm7, %vm1848_vm6 }
 0x3db   : > { %3322 = vmatprep.subr.msk.bf16.mxu0 %vm3321_vm10, %v3493_v16  ;;  %vm1832_vm13 = vmand %vm1767_vm8, %vm1800_vm9 }
 0x3dc   : > { %vm1833_vm2 = vmand %vm1768_vm11, %vm1801_vm12 }
 0x3dd   : > { %vm3323_vm1 = vmpackc.low %vm1833_vm2, %vm1832_vm13 }
 0x3de   : > { %3324 = vmatpush3.bf16.msk.msra.mxu0 %vm3323_vm1, %v3493_v16  ;;  %vm1850_vm5 = vmand %vm1785_vm15, %vm1818_vm4 }
 0x3df   : > { %vm1851_vm3 = vmand %vm1786_vm14, %vm1819_vm0  ;;  %vm4347_vm0 = vcmask 261120  }
 0x3e0   : > { %vm3325_vm6 = vmpackc.low %vm1851_vm3, %vm1850_vm5 }
 0x3e1   : > { %3326 = vmatprep.subr.msk.bf16.mxu0 %vm3325_vm6, %v3493_v16  ;;  %vm4348_vm1 = vmmov %vm4347_vm0 }
 0x3e2   : > { %vm4349_vm8 = vmmov %vm4347_vm0 }
 0x3e3   : > { %vm4350_vm9 = vmmov %vm4347_vm0 }
 0x3e4   : > { %vm4351_vm7 = vmmov %vm4347_vm0 }
 0x3e5   : > { %vm4352_vm11 = vmmov %vm4347_vm0 }
 0x3e6   : > { %vm4353_vm12 = vmmov %vm4347_vm0 }
 0x3e7   : > { %vm4354_vm10 = vmmov %vm4347_vm0 }
 0x3e8   : > { %vm4355_vm13 = vmmov %vm4347_vm0 }
 0x3e9   : > { %vm4356_vm15 = vmmov %vm4347_vm0 }
 0x3ea   : > { %vm4357_vm4 = vmmov %vm4347_vm0 }
 0x3eb   : > { %vm4358_vm2 = vmmov %vm4347_vm0 }
 0x3ec   : > { %vm4359_vm14 = vmmov %vm4347_vm0 }
 0x3ed   : > { %vm4360_vm5 = vmmov %vm4347_vm0 }
 0x3ee   : > { %vm4361_vm3 = vmmov %vm4347_vm0 }
 0x3ef   : > { %vm4362_vm6 = vmmov %vm4347_vm0 }
 0x499   : > { %v1369_v34 = vpop.f32.mrb[20].mxu0 }
 0x49a   : > { %v1371_v35 = vpop.f32.mrb[21].mxu0  ;;  %v1370_v37 = vadd.f32 %v1369_v34, %v1274_v36  ;;  %v1925_v34 = vadd.s32 16, %v1919_v32 }
 0x49b   : > { %v1372_v39 = vadd.f32 %v1371_v35, %v1274_v36  ;;  %v1926_v35 = vadd.s32 16, %v1920_v33 }
 0x49c   : > { %v1392_v44 = vmax.f32 %v1370_v37, 0.0  ;;  %v1440_v37 = vpop.permute.xlu1 %1439 }
 0x49d   : > { %v1375_v40 = vpop.f32.mrb[22].mxu0  ;;  %v1393_v46 = vmax.f32 %v1372_v39, 0.0 }
 0x49e   : > { %v1376_v41 = vadd.f32 %v1375_v40, %v1279_v38  ;;  %v1377_v42 = vpop.f32.mrb[23].mxu0 }
 0x49f   : > { %v1378_v43 = vadd.f32 %v1377_v42, %v1279_v38 }
 0x4a0   : > { %v1394_v45 = vmax.f32 %v1376_v41, 0.0 }
 0x4a1   : > { %v1395_v47 = vmax.f32 %v1378_v43, 0.0  ;;  %v1381_v48 = vpop.f32.mrb[24].mxu0 }
 0x4a2   : > { %v3295_v49 = vpack.c.bf16 %v1394_v45, %v1392_v44  ;;  %v1383_v50 = vpop.f32.mrb[25].mxu0  ;;  %v1382_v53 = vadd.f32 %v1381_v48, %v1284_v51 }
 0x4a3   : > { %v3293_v52 = vpack.c.bf16 %v1395_v47, %v1393_v46  ;;  %v1384_v55 = vadd.f32 %v1383_v50, %v1284_v51 }
 0x4a4   : > { %v1396_v60 = vmax.f32 %v1382_v53, 0.0 }
 0x4a5   : > { %v1387_v56 = vpop.f32.mrb[26].mxu0  ;;  %3294 = vmatprep.subr.bf16.mxu1 %v3293_v52  ;;  %v1397_v62 = vmax.f32 %v1384_v55, 0.0 }
 0x4a6   : > { %v1388_v57 = vadd.f32 %v1387_v56, %v1289_v54  ;;  %v1389_v58 = vpop.f32.mrb[27].mxu0  ;;  %3296 = vmatpush1.bf16.msra.mxu1 %v3295_v49  ;;  %v1450_v49 = vpop.permute.xlu1 %1449 }
 0x4a7   : > { %v1390_v59 = vadd.f32 %v1389_v58, %v1289_v54 }
 0x4a8   : > { %v1398_v61 = vmax.f32 %v1388_v57, 0.0 }
 0x4a9   : > { %v1399_v63 = vmax.f32 %v1390_v59, 0.0 }
 0x4aa   : > { %v3299_v1 = vpack.c.bf16 %v1398_v61, %v1396_v60 }
 0x4ab   : > { %v3297_v2 = vpack.c.bf16 %v1399_v63, %v1397_v62  ;;  %v1460_v63 = vpop.permute.xlu1 %1459 }
 0x4ad   : > { %3298 = vmatprep.subr.bf16.mxu1 %v3297_v2 }
 0x4ae   : > { %3300 = vmatpush1.bf16.msra.mxu1 %v3299_v1 }
 0x4b1   : > { %3052 = vmatmul.mubr.msk.f32.vlgmr.msra.gmra.mrb[16].mxu1 %vm4347_vm0, %v1400_v3  ;;  %vm1769_vm0 = vcmp.ge.s32.totalorder %v1734_v25, %v3850_v8 }
 0x4b2   : > { %1630 = vmatprep.mubr.f32.mxu1 %v3491_v0 }
 0x4b5   : > { %3053 = vmatmul.mubr.msk.f32.gmra.mrb[18].mxu1 %vm4348_vm1, %v1401_v6  ;;  %vm1770_vm1 = vcmp.ge.s32.totalorder %v1735_v26, %v3850_v8 }
 0x4b6   : > { %1636 = vmatprep.mubr.f32.mxu1 %v3491_v0 }
 0x4b9   : > { %3054 = vmatmul.mubr.msk.f32.gmra.mrb[20].mxu1 %vm4349_vm8, %v1402_v7  ;;  %vm1802_vm8 = vcmp.lt.s32.totalorder %v1734_v25, %v3854_v10 }
 0x4ba   : > { %1642 = vmatprep.mubr.f32.mxu1 %v3491_v0 }
 0x4bd   : > { %3055 = vmatmul.mubr.msk.f32.gmra.mrb[22].mxu1 %vm4350_vm9, %v1403_v13  ;;  %vm1803_vm9 = vcmp.lt.s32.totalorder %v1735_v26, %v3854_v10 }
 0x4be   : > { %1648 = vmatprep.mubr.f32.mxu1 %v3491_v0 }
 0x4c1   : > { %3056 = vmatmul.mubr.msk.f32.gmra.mrb[24].mxu1 %vm4351_vm7, %v1404_v14  ;;  %vm1834_vm7 = vmand %vm1769_vm0, %vm1802_vm8  ;;  %vm1805_vm0 = vcmp.lt.s32.totalorder %v1737_v30, %v3854_v10 }
 0x4c2   : > { %1654 = vmatprep.mubr.f32.mxu1 %v3491_v0 }
 0x4c5   : > { %3057 = vmatmul.mubr.msk.f32.gmra.mrb[26].mxu1 %vm4352_vm11, %v1405_v15  ;;  %vm1835_vm11 = vmand %vm1770_vm1, %vm1803_vm9 }
 0x4c6   : > { %1660 = vmatprep.mubr.f32.mxu1 %v3491_v0 }
 0x4c9   : > { %3058 = vmatmul.mubr.msk.f32.gmra.mrb[28].mxu1 %vm4353_vm12, %v1406_v17  ;;  %vm3327_vm12 = vmpackc.low %vm1835_vm11, %vm1834_vm7  ;;  %vm1922_vm11 = vcmp.ge.s32.totalorder %v1918_v31, %v1919_v32 }
 0x4ca   : > { %1666 = vmatprep.mubr.f32.mxu1 %v3491_v0  ;;  %3328 = vmatpush3.bf16.msk.msra.mxu0 %vm3327_vm12, %v3493_v16  ;;  %vm1924_vm12 = vcmp.ge.s32.totalorder %v1918_v31, %v1920_v33 }
 0x4cd   : > { %3059 = vmatmul.mubr.msk.f32.gmra.mrb[30].mxu1 %vm4354_vm10, %v1407_v18  ;;  %vm1787_vm10 = vcmp.ge.s32.totalorder %v1752_v27, %v3850_v8 }
 0x4ce   : > { %1672 = vmatprep.mubr.f32.mxu1 %v3491_v0 }
 0x4d1   : > { %3060 = vmatmul.mubr.msk.f32.gmra.mrb[32].mxu1 %vm4355_vm13, %v1408_v19  ;;  %vm1788_vm13 = vcmp.ge.s32.totalorder %v1753_v28, %v3850_v8 }
 0x4d2   : > { %1678 = vmatprep.mubr.f32.mxu1 %v3491_v0 }
 0x4d5   : > { %3061 = vmatmul.mubr.msk.f32.gmra.mrb[34].mxu1 %vm4356_vm15, %v1409_v20  ;;  %vm1820_vm15 = vcmp.lt.s32.totalorder %v1752_v27, %v3854_v10 }
 0x4d6   : > { %1684 = vmatprep.mubr.f32.mxu1 %v3491_v0 }
 0x4d9   : > { %3062 = vmatmul.mubr.msk.f32.gmra.mrb[36].mxu1 %vm4357_vm4, %v1410_v21  ;;  %vm1821_vm4 = vcmp.lt.s32.totalorder %v1753_v28, %v3854_v10 }
 0x4da   : > { %1690 = vmatprep.mubr.f32.mxu1 %v3491_v0 }
 0x4dd   : > { %3063 = vmatmul.mubr.msk.f32.gmra.mrb[38].mxu1 %vm4358_vm2, %v1411_v22  ;;  %vm1852_vm2 = vmand %vm1787_vm10, %vm1820_vm15  ;;  %vm1928_vm10 = vcmp.lt.s32.totalorder %v1918_v31, %v1925_v34  ;;  %v1470_v22 = vpop.permute.xlu1 %1469 }
 0x4de   : > { %1696 = vmatprep.mubr.f32.mxu1 %v3491_v0  ;;  %vm1932_vm15 = vmand %vm1922_vm11, %vm1928_vm10 }
 0x4e1   : > { %3064 = vmatmul.mubr.msk.f32.gmra.mrb[40].mxu1 %vm4359_vm14, %v1412_v23  ;;  %vm1771_vm14 = vcmp.ge.s32.totalorder %v1736_v29, %v3850_v8 }
 0x4e2   : > { %1702 = vmatprep.mubr.f32.mxu1 %v3491_v0 }
 0x4e5   : > { %3065 = vmatmul.mubr.msk.f32.gmra.mrb[42].mxu1 %vm4360_vm5, %v1413_v24  ;;  %vm1804_vm5 = vcmp.lt.s32.totalorder %v1736_v29, %v3854_v10 }
 0x4e6   : > { %1708 = vmatprep.mubr.f32.mxu1 %v3491_v0  ;;  %vm1836_vm8 = vmand %vm1771_vm14, %vm1804_vm5  ;;  %vm1923_vm5 = vcmp.ge.s32.totalorder %v3845_v5, %v1920_v33 }
 0x4e9   : > { %3066 = vmatmul.mubr.msk.f32.gmra.mrb[44].mxu1 %vm4361_vm3, %v1414_v9  ;;  %vm1853_vm3 = vmand %vm1788_vm13, %vm1821_vm4  ;;  %vm1930_vm13 = vcmp.lt.s32.totalorder %v1918_v31, %v1926_v35  ;;  %vm1921_vm4 = vcmp.ge.s32.totalorder %v3845_v5, %v1919_v32 }
 0x4ea   : > { %1714 = vmatprep.mubr.f32.mxu1 %v3491_v0  ;;  %vm3329_vm1 = vmpackc.low %vm1853_vm3, %vm1852_vm2  ;;  %vm1927_vm2 = vcmp.lt.s32.totalorder %v3845_v5, %v1925_v34  ;;  %vm1929_vm3 = vcmp.lt.s32.totalorder %v3845_v5, %v1926_v35  ;;  %v1480_v34 = vpop.permute.xlu1 %1479 }
 0x4eb   : > { %3330 = vmatprep.subr.msk.bf16.mxu0 %vm3329_vm1, %v3493_v16  ;;  %vm1934_vm14 = vmand %vm1924_vm12, %vm1930_vm13 }
 0x4ec   : > { %vm1933_vm1 = vmand %vm1923_vm5, %vm1929_vm3 }
 0x4ed   : > { %3067 = vmatmul.mubr.msk.f32.gmra.mrb[46].mxu1 %vm4362_vm6, %v1415_v11  ;;  %vm1772_vm6 = vcmp.ge.s32.totalorder %v1737_v30, %v3850_v8 }
 0x4ee   : > { %2392 = vmatprep.mubr.f32.mxu1 %v3491_v0  ;;  %vm1837_vm9 = vmand %vm1772_vm6, %vm1805_vm0 }
 0x4ef   : > { %vm3331_vm7 = vmpackc.low %vm1837_vm9, %vm1836_vm8 }
 0x4f0   : > { %3332 = vmatpush3.bf16.msk.msra.mxu0 %vm3331_vm7, %v3493_v16  ;;  %vm3333_vm6 = vmpackc.low %vm1934_vm14, %vm1932_vm15  ;;  %vm4363_vm14 = vcmask 130048  }
 0x4f1   : > { %3334 = vmatprep.subr.msk.bf16.mxu1 %vm3333_vm6, %v3493_v16  ;;  %vm1931_vm0 = vmand %vm1921_vm4, %vm1927_vm2 }
 0x4f2   : > { %vm3335_vm8 = vmpackc.low %vm1933_vm1, %vm1931_vm0 }
 0x4f3   : > { %3336 = vmatpush1.bf16.msk.msra.mxu1 %vm3335_vm8, %v3493_v16  ;;  %v1445_v16 = vpop.permute.xlu0 %1444  ;;  %vm4364_vm6 = vmmov %vm4363_vm14 }
 0x4f4   : > { %vm4365_vm8 = vmmov %vm4364_vm6 }
 0x4f7   : > { %v1455_v56 = vpop.permute.xlu0 %1454 }
 0x4fb   : > { %v1465_v14 = vpop.permute.xlu0 %1464 }
 0x4ff   : > { %v1475_v27 = vpop.permute.xlu0 %1474 }
 0x584   : > { %v1626_v8 = vpop.f32.mrb[16].mxu1 }
 0x585   : > { %v4059_v10 = vadd.f32 %v1626_v8, %v1435_v4  ;;  %v1628_v12 = vpop.f32.mrb[17].mxu1 }
 0x586   : > { %v4061_v36 = vadd.f32 %v1628_v12, %v1435_v4 }
 0x587   : > { %v1943_v39 = vmul.f32 %v4059_v10, %v4059_v10 }
 0x588   : > { %v1944_v38 = vmul.f32 %v4061_v36, %v4061_v36  ;;  %v1632_v5 = vpop.f32.mrb[18].mxu1 }
 0x589   : > { %v4067_v40 = vadd.f32 %v1632_v5, %v1440_v37  ;;  %v1634_v41 = vpop.f32.mrb[19].mxu1  ;;  %v1485_v5 = vpop.permute.xlu0 %1484 }
 0x58a   : > { %v4069_v42 = vadd.f32 %v1634_v41, %v1440_v37  ;;  %2039 = vmatprep.mubr.f32.mxu0 %v1944_v38 }
 0x58b   : > { %2040 = vmatmul.mubr.f32.vlgmr.msra.gmra.mrb[28].mxu0 %v1943_v39  ;;  %v1945_v45 = vmul.f32 %v4067_v40, %v4067_v40 }
 0x58c   : > { %v1946_v43 = vmul.f32 %v4069_v42, %v4069_v42  ;;  %v1638_v44 = vpop.f32.mrb[20].mxu1 }
 0x58d   : > { %v4075_v46 = vadd.f32 %v1638_v44, %v1445_v16  ;;  %v1640_v47 = vpop.f32.mrb[21].mxu1 }
 0x58e   : > { %v4077_v48 = vadd.f32 %v1640_v47, %v1445_v16  ;;  %2044 = vmatprep.mubr.f32.mxu0 %v1946_v43  ;;  %v1490_v47 = vpop.permute.xlu1 %1489 }
 0x58f   : > { %2045 = vmatmul.mubr.f32.gmra.mrb[30].mxu0 %v1945_v45  ;;  %v1947_v52 = vmul.f32 %v4075_v46, %v4075_v46 }
 0x590   : > { %v1948_v50 = vmul.f32 %v4077_v48, %v4077_v48  ;;  %v1644_v51 = vpop.f32.mrb[22].mxu1 }
 0x591   : > { %v4083_v53 = vadd.f32 %v1644_v51, %v1450_v49  ;;  %v1646_v54 = vpop.f32.mrb[23].mxu1 }
 0x592   : > { %v4085_v55 = vadd.f32 %v1646_v54, %v1450_v49  ;;  %2049 = vmatprep.mubr.f32.mxu0 %v1948_v50 }
 0x593   : > { %2050 = vmatmul.mubr.f32.gmra.mrb[32].mxu0 %v1947_v52  ;;  %v1949_v59 = vmul.f32 %v4083_v53, %v4083_v53 }
 0x594   : > { %v1950_v57 = vmul.f32 %v4085_v55, %v4085_v55  ;;  %v1650_v58 = vpop.f32.mrb[24].mxu1 }
 0x595   : > { %v4091_v60 = vadd.f32 %v1650_v58, %v1455_v56  ;;  %v1652_v61 = vpop.f32.mrb[25].mxu1 }
 0x596   : > { %v4093_v62 = vadd.f32 %v1652_v61, %v1455_v56  ;;  %2054 = vmatprep.mubr.f32.mxu0 %v1950_v57  ;;  %v1495_v57 = vpop.permute.xlu0 %1494 }
 0x597   : > { %2055 = vmatmul.mubr.f32.gmra.mrb[34].mxu0 %v1949_v59  ;;  %v1951_v3 = vmul.f32 %v4091_v60, %v4091_v60 }
 0x598   : > { %v1952_v1 = vmul.f32 %v4093_v62, %v4093_v62  ;;  %v1656_v2 = vpop.f32.mrb[26].mxu1 }
 0x599   : > { %v4099_v6 = vadd.f32 %v1656_v2, %v1460_v63  ;;  %v1658_v7 = vpop.f32.mrb[27].mxu1 }
 0x59a   : > { %v4101_v13 = vadd.f32 %v1658_v7, %v1460_v63  ;;  %2059 = vmatprep.mubr.f32.mxu0 %v1952_v1 }
 0x59b   : > { %2060 = vmatmul.mubr.f32.gmra.mrb[36].mxu0 %v1951_v3  ;;  %v1953_v18 = vmul.f32 %v4099_v6, %v4099_v6  ;;  %v1500_v3 = vpop.permute.xlu1 %1499 }
 0x59c   : > { %v1954_v15 = vmul.f32 %v4101_v13, %v4101_v13  ;;  %v1662_v17 = vpop.f32.mrb[28].mxu1 }
 0x59d   : > { %v4107_v19 = vadd.f32 %v1662_v17, %v1465_v14  ;;  %v1664_v20 = vpop.f32.mrb[29].mxu1 }
 0x59e   : > { %v4109_v21 = vadd.f32 %v1664_v20, %v1465_v14  ;;  %2064 = vmatprep.mubr.f32.mxu0 %v1954_v15 }
 0x59f   : > { %2065 = vmatmul.mubr.f32.gmra.mrb[38].mxu0 %v1953_v18  ;;  %v1955_v9 = vmul.f32 %v4107_v19, %v4107_v19 }
 0x5a0   : > { %v1956_v23 = vmul.f32 %v4109_v21, %v4109_v21  ;;  %v1668_v24 = vpop.f32.mrb[30].mxu1 }
 0x5a1   : > { %v4115_v11 = vadd.f32 %v1668_v24, %v1470_v22  ;;  %v1670_v25 = vpop.f32.mrb[31].mxu1 }
 0x5a2   : > { %v4117_v26 = vadd.f32 %v1670_v25, %v1470_v22  ;;  %2069 = vmatprep.mubr.f32.mxu0 %v1956_v23  ;;  %v1505_v22 = vpop.permute.xlu0 %1504 }
 0x5a3   : > { %2070 = vmatmul.mubr.f32.gmra.mrb[40].mxu0 %v1955_v9  ;;  %v1957_v30 = vmul.f32 %v4115_v11, %v4115_v11 }
 0x5a4   : > { %v1958_v28 = vmul.f32 %v4117_v26, %v4117_v26  ;;  %v1674_v29 = vpop.f32.mrb[32].mxu1 }
 0x5a5   : > { %v4123_v31 = vadd.f32 %v1674_v29, %v1475_v27  ;;  %v1676_v32 = vpop.f32.mrb[33].mxu1  ;;  %v1510_v29 = vpop.permute.xlu1 %1509 }
 0x5a6   : > { %v4125_v33 = vadd.f32 %v1676_v32, %v1475_v27  ;;  %2074 = vmatprep.mubr.f32.mxu0 %v1958_v28 }
 0x5a7   : > { %2075 = vmatmul.mubr.f32.gmra.mrb[42].mxu0 %v1957_v30  ;;  %v1959_v8 = vmul.f32 %v4123_v31, %v4123_v31 }
 0x5a8   : > { %v1960_v35 = vmul.f32 %v4125_v33, %v4125_v33  ;;  %v1680_v4 = vpop.f32.mrb[34].mxu1 }
 0x5a9   : > { %v4131_v12 = vadd.f32 %v1680_v4, %v1480_v34  ;;  %v1682_v37 = vpop.f32.mrb[35].mxu1 }
 0x5aa   : > { %v4133_v38 = vadd.f32 %v1682_v37, %v1480_v34  ;;  %2079 = vmatprep.mubr.f32.mxu0 %v1960_v35 }
 0x5ab   : > { %2080 = vmatmul.mubr.f32.gmra.mrb[44].mxu0 %v1959_v8  ;;  %v1961_v16 = vmul.f32 %v4131_v12, %v4131_v12 }
 0x5ac   : > { %v1962_v39 = vmul.f32 %v4133_v38, %v4133_v38  ;;  %v1686_v41 = vpop.f32.mrb[36].mxu1 }
 0x5ad   : > { %v4139_v43 = vadd.f32 %v1686_v41, %v1485_v5  ;;  %v1688_v44 = vpop.f32.mrb[37].mxu1 }
 0x5ae   : > { %v4141_v45 = vadd.f32 %v1688_v44, %v1485_v5  ;;  %2084 = vmatprep.mubr.f32.mxu0 %v1962_v39 }
 0x5af   : > { %2085 = vmatmul.mubr.f32.gmra.mrb[46].mxu0 %v1961_v16  ;;  %v1963_v51 = vmul.f32 %v4139_v43, %v4139_v43 }
 0x5b0   : > { %v1964_v49 = vmul.f32 %v4141_v45, %v4141_v45  ;;  %v1692_v50 = vpop.f32.mrb[38].mxu1 }
 0x5b1   : > { %v4147_v52 = vadd.f32 %v1692_v50, %v1490_v47  ;;  %v1694_v54 = vpop.f32.mrb[39].mxu1 }
 0x5b2   : > { %v4149_v56 = vadd.f32 %v1694_v54, %v1490_v47  ;;  %2089 = vmatprep.mubr.f32.mxu0 %v1964_v49 }
 0x5b3   : > { %2090 = vmatmul.mubr.f32.gmra.mrb[48].mxu0 %v1963_v51  ;;  %v1965_v61 = vmul.f32 %v4147_v52, %v4147_v52 }
 0x5b4   : > { %v1966_v58 = vmul.f32 %v4149_v56, %v4149_v56  ;;  %v1698_v59 = vpop.f32.mrb[40].mxu1 }
 0x5b5   : > { %v4155_v63 = vadd.f32 %v1698_v59, %v1495_v57  ;;  %v1700_v1 = vpop.f32.mrb[41].mxu1 }
 0x5b6   : > { %v4157_v2 = vadd.f32 %v1700_v1, %v1495_v57  ;;  %2094 = vmatprep.mubr.f32.mxu0 %v1966_v58 }
 0x5b7   : > { %2095 = vmatmul.mubr.f32.gmra.mrb[50].mxu0 %v1965_v61  ;;  %v1967_v15 = vmul.f32 %v4155_v63, %v4155_v63 }
 0x5b8   : > { %v1968_v7 = vmul.f32 %v4157_v2, %v4157_v2  ;;  %v1704_v14 = vpop.f32.mrb[42].mxu1 }
 0x5b9   : > { %v4163_v17 = vadd.f32 %v1704_v14, %v1500_v3  ;;  %v1706_v18 = vpop.f32.mrb[43].mxu1 }
 0x5ba   : > { %v4165_v20 = vadd.f32 %v1706_v18, %v1500_v3  ;;  %2099 = vmatprep.mubr.f32.mxu0 %v1968_v7 }
 0x5bb   : > { %2100 = vmatmul.mubr.f32.gmra.mrb[52].mxu0 %v1967_v15  ;;  %v1969_v9 = vmul.f32 %v4163_v17, %v4163_v17 }
 0x5bc   : > { %v1970_v23 = vmul.f32 %v4165_v20, %v4165_v20  ;;  %v1710_v24 = vpop.f32.mrb[44].mxu1 }
 0x5bd   : > { %v4171_v25 = vadd.f32 %v1710_v24, %v1505_v22  ;;  %v1712_v27 = vpop.f32.mrb[45].mxu1 }
 0x5be   : > { %v4173_v28 = vadd.f32 %v1712_v27, %v1505_v22  ;;  %2104 = vmatprep.mubr.f32.mxu0 %v1970_v23 }
 0x5bf   : > { %2105 = vmatmul.mubr.f32.gmra.mrb[54].mxu0 %v1969_v9  ;;  %v1971_v34 = vmul.f32 %v4171_v25, %v4171_v25 }
 0x5c0   : > { %v1972_v30 = vmul.f32 %v4173_v28, %v4173_v28  ;;  %v1716_v32 = vpop.f32.mrb[46].mxu1 }
 0x5c1   : > { %v4179_v35 = vadd.f32 %v1716_v32, %v1510_v29  ;;  %v1718_v4 = vpop.f32.mrb[47].mxu1 }
 0x5c2   : > { %v4181_v8 = vadd.f32 %v1718_v4, %v1510_v29  ;;  %2109 = vmatprep.mubr.f32.mxu0 %v1972_v30 }
 0x5c3   : > { %2110 = vmatmul.mubr.f32.gmra.mrb[56].mxu0 %v1971_v34  ;;  %v1973_v5 = vmul.f32 %v4179_v35, %v4179_v35 }
 0x5c4   : > { %v1974_v37 = vmul.f32 %v4181_v8, %v4181_v8 }
 0x5c6   : > { %2114 = vmatprep.mubr.f32.mxu0 %v1974_v37 }
 0x5c7   : > { %2115 = vmatmul.mubr.f32.gmra.mrb[58].mxu0 %v1973_v5 }
 0x5c8   : > { %2585 = vmatprep.mubr.f32.mxu0 %v3491_v0 }
 0x65e   : > { %v3205_v39 = vpop.f32.mrb[28].mxu0 }
 0x65f   : > { %v3206_v41 = vpop.f32.mrb[29].mxu0 }
 0x660   : > { %v3207_v16 = vadd.f32 %v3206_v41, %v3205_v39 }
 0x662   : > { %3402 = vrsqrt.f32 %v3207_v16  ;;  %v3208_v44 = vpop.f32.mrb[30].mxu0  ;;  %vm2122_vm9 = vcmp.eq.f32.partialorder %v3207_v16, inf  ;;  %v2125_v3 = vand.u32 2147483648, %v3207_v16  ;;  %vm2124_vm7 = vcmp.eq.f32.partialorder %v3207_v16, 0.0 }
 0x663   : > { %v3209_v47 = vpop.f32.mrb[31].mxu0 }
 0x664   : > { %v3210_v49 = vadd.f32 %v3209_v47, %v3208_v44 }
 0x666   : > { %3404 = vrsqrt.f32 %v3210_v49  ;;  %v3211_v50 = vpop.f32.mrb[32].mxu0  ;;  %vm2129_vm11 = vcmp.eq.f32.partialorder %v3210_v49, inf  ;;  %v2132_v27 = vand.u32 2147483648, %v3210_v49  ;;  %vm2131_vm12 = vcmp.eq.f32.partialorder %v3210_v49, 0.0 }
 0x667   : > { %v3212_v51 = vpop.f32.mrb[33].mxu0 }
 0x668   : > { %v3213_v54 = vadd.f32 %v3212_v51, %v3211_v50 }
 0x66a   : > { %3406 = vrsqrt.f32 %v3213_v54  ;;  %v3214_v57 = vpop.f32.mrb[34].mxu0  ;;  %vm2136_vm10 = vcmp.eq.f32.partialorder %v3213_v54, inf  ;;  %v2139_v41 = vand.u32 2147483648, %v3213_v54  ;;  %vm2138_vm13 = vcmp.eq.f32.partialorder %v3213_v54, 0.0 }
 0x66b   : > { %v3215_v58 = vpop.f32.mrb[35].mxu0 }
 0x66c   : > { %v3403_v59 = vpop.eup %3402  ;;  %v3216_v61 = vadd.f32 %v3215_v58, %v3214_v57 }
 0x66d   : > { %v2121_v1 = vmul.f32 %v3403_v59, %v3207_v16 }
 0x66e   : > { %3408 = vrsqrt.f32 %v3216_v61  ;;  %v3217_v7 = vpop.f32.mrb[36].mxu0  ;;  %vm2143_vm15 = vcmp.eq.f32.partialorder %v3216_v61, inf  ;;  %vm2145_vm4 = vcmp.eq.f32.partialorder %v3216_v61, 0.0 }
 0x66f   : > { %v2123_v14 = vsel %vm2122_vm9, %v3207_v16, %v2121_v1  ;;  %v3218_v15 = vpop.f32.mrb[37].mxu0 }
 0x670   : > { %v3405_v18 = vpop.eup %3404  ;;  %v2126_v22 = vsel %vm2124_vm7, %v2125_v3, %v2123_v14  ;;  %v3219_v23 = vadd.f32 %v3218_v15, %v3217_v7 }
 0x671   : > { %v2232_v24 = vmax.f32 %v2126_v22, 1e-12  ;;  %v2128_v9 = vmul.f32 %v3405_v18, %v3210_v49 }
 0x672   : > { %3410 = vrsqrt.f32 %v3219_v23  ;;  %v3220_v29 = vpop.f32.mrb[38].mxu0  ;;  %vm2150_vm2 = vcmp.eq.f32.partialorder %v3219_v23, inf  ;;  %vm2152_vm5 = vcmp.eq.f32.partialorder %v3219_v23, 0.0 }
 0x673   : > { %3412 = vrcp.f32 %v2232_v24  ;;  %v2130_v30 = vsel %vm2129_vm11, %v3210_v49, %v2128_v9  ;;  %v3221_v32 = vpop.f32.mrb[39].mxu0  ;;  %v2146_v49 = vand.u32 2147483648, %v3216_v61  ;;  %v2153_v9 = vand.u32 2147483648, %v3219_v23  ;;  %vm4366_vm11 = vmmov %vm4364_vm6 }
 0x674   : > { %v3407_v34 = vpop.eup %3406  ;;  %v2133_v4 = vsel %vm2131_vm12, %v2132_v27, %v2130_v30  ;;  %v3222_v37 = vadd.f32 %v3221_v32, %v3220_v29 }
 0x675   : > { %v2233_v5 = vmax.f32 %v2133_v4, 1e-12  ;;  %v2135_v39 = vmul.f32 %v3407_v34, %v3213_v54 }
 0x676   : > { %3414 = vrsqrt.f32 %v3222_v37  ;;  %v3223_v16 = vpop.f32.mrb[40].mxu0  ;;  %vm2157_vm3 = vcmp.eq.f32.partialorder %v3222_v37, inf  ;;  %vm2159_vm0 = vcmp.eq.f32.partialorder %v3222_v37, 0.0 }
 0x677   : > { %3416 = vrcp.f32 %v2233_v5  ;;  %v2137_v44 = vsel %vm2136_vm10, %v3213_v54, %v2135_v39  ;;  %v3224_v47 = vpop.f32.mrb[41].mxu0 }
 0x678   : > { %v3409_v50 = vpop.eup %3408  ;;  %v2140_v51 = vsel %vm2138_vm13, %v2139_v41, %v2137_v44  ;;  %v3225_v57 = vadd.f32 %v3224_v47, %v3223_v16  ;;  %v2160_v41 = vand.u32 2147483648, %v3222_v37  ;;  %vm4367_vm13 = vmmov %vm4364_vm6 }
 0x679   : > { %v2234_v58 = vmax.f32 %v2140_v51, 1e-12  ;;  %v2142_v59 = vmul.f32 %v3409_v50, %v3216_v61 }
 0x67a   : > { %3418 = vrsqrt.f32 %v3225_v57  ;;  %v3226_v1 = vpop.f32.mrb[42].mxu0  ;;  %vm2164_vm1 = vcmp.eq.f32.partialorder %v3225_v57, inf  ;;  %vm2166_vm9 = vcmp.eq.f32.partialorder %v3225_v57, 0.0 }
 0x67b   : > { %3420 = vrcp.f32 %v2234_v58  ;;  %v2144_v3 = vsel %vm2143_vm15, %v3216_v61, %v2142_v59  ;;  %v3227_v7 = vpop.f32.mrb[43].mxu0 }
 0x67c   : > { %v3411_v14 = vpop.eup %3410  ;;  %v2147_v15 = vsel %vm2145_vm4, %v2146_v49, %v2144_v3  ;;  %v4188_v18 = vadd.f32 %v3227_v7, %v3226_v1  ;;  %v2167_v1 = vand.u32 2147483648, %v3225_v57 }
 0x67d   : > { %v3413_v22 = vpop.eup %3412  ;;  %v2235_v54 = vmax.f32 %v2147_v15, 1e-12  ;;  %v2149_v24 = vmul.f32 %v3411_v14, %v3219_v23 }
 0x67e   : > { %3422 = vrsqrt.f32 %v4188_v18  ;;  %v3229_v27 = vpop.f32.mrb[44].mxu0  ;;  %3140 = vmatmul.mubr.msk.f32.vlgmr.msra.gmra.mrb[48].mxu1 %vm4363_vm14, %v3413_v22  ;;  %vm2171_vm7 = vcmp.eq.f32.partialorder %v4188_v18, inf  ;;  %vm2173_vm12 = vcmp.eq.f32.partialorder %v4188_v18, 0.0 }
 0x67f   : > { %3424 = vrcp.f32 %v2235_v54  ;;  %v2151_v29 = vsel %vm2150_vm2, %v3219_v23, %v2149_v24  ;;  %v3230_v30 = vpop.f32.mrb[45].mxu0  ;;  %2398 = vmatprep.mubr.f32.mxu1 %v3491_v0  ;;  %vm4368_vm2 = vmmov %vm4364_vm6 }
 0x680   : > { %v3415_v61 = vpop.eup %3414  ;;  %v2154_v32 = vsel %vm2152_vm5, %v2153_v9, %v2151_v29  ;;  %v4193_v34 = vadd.f32 %v3230_v30, %v3229_v27  ;;  %v2174_v27 = vand.u32 2147483648, %v4188_v18 }
 0x681   : > { %v3417_v4 = vpop.eup %3416  ;;  %v2236_v5 = vmax.f32 %v2154_v32, 1e-12  ;;  %v2156_v39 = vmul.f32 %v3415_v61, %v3222_v37 }
 0x682   : > { %3426 = vrsqrt.f32 %v4193_v34  ;;  %v3232_v16 = vpop.f32.mrb[46].mxu0  ;;  %3141 = vmatmul.mubr.msk.f32.gmra.mrb[50].mxu1 %vm4364_vm6, %v3417_v4  ;;  %vm2178_vm10 = vcmp.eq.f32.partialorder %v4193_v34, inf  ;;  %vm2180_vm15 = vcmp.eq.f32.partialorder %v4193_v34, 0.0 }
 0x683   : > { %3428 = vrcp.f32 %v2236_v5  ;;  %v2158_v44 = vsel %vm2157_vm3, %v3222_v37, %v2156_v39  ;;  %v3233_v23 = vpop.f32.mrb[47].mxu0  ;;  %2404 = vmatprep.mubr.f32.mxu1 %v3491_v0  ;;  %vm4369_vm3 = vmmov %vm4368_vm2 }
 0x684   : > { %v3419_v47 = vpop.eup %3418  ;;  %v2161_v50 = vsel %vm2159_vm0, %v2160_v41, %v2158_v44  ;;  %v4198_v51 = vadd.f32 %v3233_v23, %v3232_v16  ;;  %v2181_v16 = vand.u32 2147483648, %v4193_v34 }
 0x685   : > { %v3421_v58 = vpop.eup %3420  ;;  %v2237_v59 = vmax.f32 %v2161_v50, 1e-12  ;;  %v2163_v49 = vmul.f32 %v3419_v47, %v3225_v57 }
 0x686   : > { %3430 = vrsqrt.f32 %v4198_v51  ;;  %v3235_v3 = vpop.f32.mrb[48].mxu0  ;;  %3142 = vmatmul.mubr.msk.f32.gmra.mrb[52].mxu1 %vm4365_vm8, %v3421_v58  ;;  %vm2185_vm4 = vcmp.eq.f32.partialorder %v4198_v51, inf  ;;  %vm2187_vm14 = vcmp.eq.f32.partialorder %v4198_v51, 0.0 }
 0x687   : > { %3432 = vrcp.f32 %v2237_v59  ;;  %v2165_v7 = vsel %vm2164_vm1, %v3225_v57, %v2163_v49  ;;  %v3236_v37 = vpop.f32.mrb[49].mxu0  ;;  %2410 = vmatprep.mubr.f32.mxu1 %v3491_v0  ;;  %vm4370_vm1 = vmmov %vm4368_vm2 }
 0x688   : > { %v3423_v14 = vpop.eup %3422  ;;  %v2168_v15 = vsel %vm2166_vm9, %v2167_v1, %v2165_v7  ;;  %v4203_v22 = vadd.f32 %v3236_v37, %v3235_v3  ;;  %v2188_v3 = vand.u32 2147483648, %v4198_v51 }
 0x689   : > { %v3425_v54 = vpop.eup %3424  ;;  %v2238_v24 = vmax.f32 %v2168_v15, 1e-12  ;;  %v2170_v9 = vmul.f32 %v3423_v14, %v4188_v18 }
 0x68a   : > { %3434 = vrsqrt.f32 %v4203_v22  ;;  %v3238_v29 = vpop.f32.mrb[50].mxu0  ;;  %3143 = vmatmul.mubr.msk.f32.gmra.mrb[54].mxu1 %vm4366_vm11, %v3425_v54  ;;  %vm2192_vm5 = vcmp.eq.f32.partialorder %v4203_v22, inf  ;;  %vm2194_vm6 = vcmp.eq.f32.partialorder %v4203_v22, 0.0 }
 0x68b   : > { %3436 = vrcp.f32 %v2238_v24  ;;  %v2172_v57 = vsel %vm2171_vm7, %v4188_v18, %v2170_v9  ;;  %v3239_v30 = vpop.f32.mrb[51].mxu0  ;;  %2416 = vmatprep.mubr.f32.mxu1 %v3491_v0  ;;  %vm4371_vm7 = vmmov %vm4370_vm1 }
 0x68c   : > { %v3427_v61 = vpop.eup %3426  ;;  %v2175_v32 = vsel %vm2173_vm12, %v2174_v27, %v2172_v57  ;;  %v4213_v4 = vadd.f32 %v3239_v30, %v3238_v29  ;;  %v2195_v29 = vand.u32 2147483648, %v4203_v22 }
 0x68d   : > { %v3429_v5 = vpop.eup %3428  ;;  %v2239_v39 = vmax.f32 %v2175_v32, 1e-12  ;;  %v2177_v41 = vmul.f32 %v3427_v61, %v4193_v34 }
 0x68e   : > { %3438 = vrsqrt.f32 %v4213_v4  ;;  %v3241_v44 = vpop.f32.mrb[52].mxu0  ;;  %3144 = vmatmul.mubr.msk.f32.gmra.mrb[56].mxu1 %vm4367_vm13, %v3429_v5  ;;  %vm2199_vm0 = vcmp.eq.f32.partialorder %v4213_v4, inf  ;;  %vm2201_vm8 = vcmp.eq.f32.partialorder %v4213_v4, 0.0 }
 0x68f   : > { %3440 = vrcp.f32 %v2239_v39  ;;  %v2179_v18 = vsel %vm2178_vm10, %v4193_v34, %v2177_v41  ;;  %v3242_v23 = vpop.f32.mrb[53].mxu0  ;;  %2422 = vmatprep.mubr.f32.mxu1 %v3491_v0  ;;  %vm4372_vm10 = vmmov %vm4370_vm1 }
 0x690   : > { %v3431_v47 = vpop.eup %3430  ;;  %v2182_v50 = vsel %vm2180_vm15, %v2181_v16, %v2179_v18  ;;  %v4223_v58 = vadd.f32 %v3242_v23, %v3241_v44  ;;  %v2202_v44 = vand.u32 2147483648, %v4213_v4 }
 0x691   : > { %v3433_v59 = vpop.eup %3432  ;;  %v2240_v49 = vmax.f32 %v2182_v50, 1e-12  ;;  %v2184_v1 = vmul.f32 %v3431_v47, %v4198_v51 }
 0x692   : > { %3442 = vrsqrt.f32 %v4223_v58  ;;  %v3244_v7 = vpop.f32.mrb[54].mxu0  ;;  %3145 = vmatmul.mubr.msk.f32.gmra.mrb[58].mxu1 %vm4368_vm2, %v3433_v59  ;;  %vm2206_vm9 = vcmp.eq.f32.partialorder %v4223_v58, inf  ;;  %vm2208_vm11 = vcmp.eq.f32.partialorder %v4223_v58, 0.0 }
 0x693   : > { %3444 = vrcp.f32 %v2240_v49  ;;  %v2186_v34 = vsel %vm2185_vm4, %v4198_v51, %v2184_v1  ;;  %v3245_v37 = vpop.f32.mrb[55].mxu0  ;;  %2428 = vmatprep.mubr.f32.mxu1 %v3491_v0  ;;  %vm4373_vm4 = vmmov %vm4370_vm1 }
 0x694   : > { %v3435_v14 = vpop.eup %3434  ;;  %v2189_v15 = vsel %vm2187_vm14, %v2188_v3, %v2186_v34  ;;  %v3246_v54 = vadd.f32 %v3245_v37, %v3244_v7  ;;  %v2209_v7 = vand.u32 2147483648, %v4223_v58 }
 0x695   : > { %v3437_v24 = vpop.eup %3436  ;;  %v2241_v9 = vmax.f32 %v2189_v15, 1e-12  ;;  %v2191_v27 = vmul.f32 %v3435_v14, %v4203_v22 }
 0x696   : > { %3446 = vrsqrt.f32 %v3246_v54  ;;  %v3247_v57 = vpop.f32.mrb[56].mxu0  ;;  %3146 = vmatmul.mubr.msk.f32.gmra.mrb[60].mxu1 %vm4369_vm3, %v3437_v24  ;;  %vm2213_vm12 = vcmp.eq.f32.partialorder %v3246_v54, inf  ;;  %vm2215_vm13 = vcmp.eq.f32.partialorder %v3246_v54, 0.0 }
 0x697   : > { %3448 = vrcp.f32 %v2241_v9  ;;  %v2193_v51 = vsel %vm2192_vm5, %v4203_v22, %v2191_v27  ;;  %v3248_v30 = vpop.f32.mrb[57].mxu0  ;;  %2434 = vmatprep.mubr.f32.mxu1 %v3491_v0  ;;  %v2216_v9 = vand.u32 2147483648, %v3246_v54  ;;  %vm4374_vm5 = vmmov %vm4370_vm1 }
 0x698   : > { %v3439_v61 = vpop.eup %3438  ;;  %v2196_v32 = vsel %vm2194_vm6, %v2195_v29, %v2193_v51  ;;  %v3249_v5 = vadd.f32 %v3248_v30, %v3247_v57  ;;  %vm4375_vm6 = vmmov %vm4370_vm1 }
 0x699   : > { %v3441_v39 = vpop.eup %3440  ;;  %v2242_v41 = vmax.f32 %v2196_v32, 1e-12  ;;  %v2198_v16 = vmul.f32 %v3439_v61, %v4213_v4 }
 0x69a   : > { %3450 = vrsqrt.f32 %v3249_v5  ;;  %v3250_v18 = vpop.f32.mrb[58].mxu0  ;;  %3147 = vmatmul.mubr.msk.f32.gmra.mrb[62].mxu1 %vm4370_vm1, %v3441_v39  ;;  %vm2220_vm15 = vcmp.eq.f32.partialorder %v3249_v5, inf  ;;  %v2223_v61 = vand.u32 2147483648, %v3249_v5  ;;  %vm2222_vm2 = vcmp.eq.f32.partialorder %v3249_v5, 0.0 }
 0x69b   : > { %3452 = vrcp.f32 %v2242_v41  ;;  %v2200_v22 = vsel %vm2199_vm0, %v4213_v4, %v2198_v16  ;;  %v3251_v23 = vpop.f32.mrb[59].mxu0  ;;  %2440 = vmatprep.mubr.f32.mxu1 %v3491_v0  ;;  %vm4376_vm0 = vmmov %vm4370_vm1 }
 0x69c   : > { %v3443_v47 = vpop.eup %3442  ;;  %v2203_v50 = vsel %vm2201_vm8, %v2202_v44, %v2200_v22  ;;  %v3252_v59 = vadd.f32 %v3251_v23, %v3250_v18  ;;  %vm4377_vm1 = vmmov %vm4376_vm0 }
 0x69d   : > { %v3445_v49 = vpop.eup %3444  ;;  %v2243_v1 = vmax.f32 %v2203_v50, 1e-12  ;;  %v2205_v3 = vmul.f32 %v3443_v47, %v4223_v58  ;;  %vm4378_vm8 = vmmov %vm4376_vm0 }
 0x69e   : > { %3454 = vrsqrt.f32 %v3252_v59  ;;  %3148 = vmatmul.mubr.msk.f32.gmra.mrb[64].mxu1 %vm4371_vm7, %v3445_v49  ;;  %vm2227_vm14 = vcmp.eq.f32.partialorder %v3252_v59, inf  ;;  %v2230_v18 = vand.u32 2147483648, %v3252_v59  ;;  %vm2229_vm3 = vcmp.eq.f32.partialorder %v3252_v59, 0.0 }
 0x69f   : > { %3456 = vrcp.f32 %v2243_v1  ;;  %v2207_v4 = vsel %vm2206_vm9, %v4223_v58, %v2205_v3  ;;  %2446 = vmatprep.mubr.f32.mxu1 %v3491_v0  ;;  %vm4379_vm9 = vcmask 261120  }
 0x6a0   : > { %v3447_v34 = vpop.eup %3446  ;;  %v2210_v37 = vsel %vm2208_vm11, %v2209_v7, %v2207_v4  ;;  %vm4380_vm7 = vmmov %vm4379_vm9 }
 0x6a1   : > { %v3449_v14 = vpop.eup %3448  ;;  %v2244_v15 = vmax.f32 %v2210_v37, 1e-12  ;;  %v2212_v24 = vmul.f32 %v3447_v34, %v3246_v54  ;;  %vm4381_vm11 = vmmov %vm4380_vm7 }
 0x6a2   : > { %3149 = vmatmul.mubr.msk.f32.gmra.mrb[66].mxu1 %vm4372_vm10, %v3449_v14 }
 0x6a3   : > { %3458 = vrcp.f32 %v2244_v15  ;;  %v2214_v27 = vsel %vm2213_vm12, %v3246_v54, %v2212_v24  ;;  %2452 = vmatprep.mubr.f32.mxu1 %v3491_v0  ;;  %vm4382_vm12 = vmmov %vm4380_vm7 }
 0x6a4   : > { %v3451_v29 = vpop.eup %3450  ;;  %v2217_v57 = vsel %vm2215_vm13, %v2216_v9, %v2214_v27 }
 0x6a5   : > { %v3453_v51 = vpop.eup %3452  ;;  %v2245_v58 = vmax.f32 %v2217_v57, 1e-12  ;;  %v2219_v30 = vmul.f32 %v3451_v29, %v3249_v5 }
 0x6a6   : > { %3150 = vmatmul.mubr.msk.f32.gmra.mrb[68].mxu1 %vm4373_vm4, %v3453_v51 }
 0x6a7   : > { %3460 = vrcp.f32 %v2245_v58  ;;  %v2221_v32 = vsel %vm2220_vm15, %v3249_v5, %v2219_v30  ;;  %2458 = vmatprep.mubr.f32.mxu1 %v3491_v0 }
 0x6a8   : > { %v3455_v39 = vpop.eup %3454  ;;  %v2224_v41 = vsel %vm2222_vm2, %v2223_v61, %v2221_v32 }
 0x6a9   : > { %v3457_v16 = vpop.eup %3456  ;;  %v2246_v54 = vmax.f32 %v2224_v41, 1e-12  ;;  %v2226_v44 = vmul.f32 %v3455_v39, %v3252_v59 }
 0x6aa   : > { %3151 = vmatmul.mubr.msk.f32.gmra.mrb[70].mxu1 %vm4374_vm5, %v3457_v16 }
 0x6ab   : > { %3462 = vrcp.f32 %v2246_v54  ;;  %v2228_v22 = vsel %vm2227_vm14, %v3252_v59, %v2226_v44  ;;  %2464 = vmatprep.mubr.f32.mxu1 %v3491_v0  ;;  %v4280_v44 = vld [vmem:[%s3786_s0] sm:$0xff]  ;;  %s3172_s0 = sshll.u32 %s4388_s21, 6 }
 0x6ac   : > { %v2231_v23 = vsel %vm2229_vm3, %v2230_v18, %v2228_v22  ;;  %s626_s26 = scalar_lea.vmem %s4342_s16, %s3172_s0 }
 0x6ad   : > { %v3459_v47 = vpop.eup %3458  ;;  %v2247_v50 = vmax.f32 %v2231_v23, 1e-12 }
 0x6ae   : > { %3152 = vmatmul.mubr.msk.f32.gmra.mrb[72].mxu1 %vm4375_vm6, %v3459_v47 }
 0x6af   : > { %3464 = vrcp.f32 %v2247_v50  ;;  %2470 = vmatprep.mubr.f32.mxu1 %v3491_v0 }
 0x6b1   : > { %v3461_v5 = vpop.eup %3460 }
 0x6b2   : > { %3153 = vmatmul.mubr.msk.f32.gmra.mrb[74].mxu1 %vm4376_vm0, %v3461_v5 }
 0x6b3   : > { %2476 = vmatprep.mubr.f32.mxu1 %v3491_v0 }
 0x6b5   : > { %v3463_v49 = vpop.eup %3462 }
 0x6b6   : > { %3154 = vmatmul.mubr.msk.f32.gmra.mrb[76].mxu1 %vm4377_vm1, %v3463_v49 }
 0x6b7   : > { %2482 = vmatprep.mubr.f32.mxu1 %v3491_v0 }
 0x6b9   : > { %v3465_v59 = vpop.eup %3464 }
 0x6ba   : > { %3155 = vmatmul.mubr.msk.f32.gmra.mrb[78].mxu1 %vm4378_vm8, %v3465_v59 }
 0x751   : > { %v2394_v1 = vpop.f32.mrb[48].mxu1 }
 0x752   : > { %v2396_v3 = vpop.f32.mrb[49].mxu1  ;;  %v2489_v4 = vmul.f32 %v2394_v1, %v4059_v10 }
 0x753   : > { %v2490_v14 = vmul.f32 %v2396_v3, %v4061_v36 }
 0x755   : > { %v2400_v7 = vpop.f32.mrb[50].mxu1 }
 0x756   : > { %v2491_v34 = vmul.f32 %v2400_v7, %v4067_v40  ;;  %v2402_v37 = vpop.f32.mrb[51].mxu1 }
 0x757   : > { %v2492_v15 = vmul.f32 %v2402_v37, %v4069_v42 }
 0x758   : > { %v3339_v24 = vpack.c.bf16 %v2491_v34, %v2489_v4 }
 0x759   : > { %v3337_v9 = vpack.c.bf16 %v2492_v15, %v2490_v14  ;;  %v2406_v27 = vpop.f32.mrb[52].mxu1 }
 0x75a   : > { %v2408_v29 = vpop.f32.mrb[53].mxu1  ;;  %v2493_v51 = vmul.f32 %v2406_v27, %v4075_v46 }
 0x75b   : > { %3338 = vmatprep.subr.bf16.mxu0 %v3337_v9  ;;  %v2494_v40 = vmul.f32 %v2408_v29, %v4077_v48 }
 0x75c   : > { %3340 = vmatpush1.bf16.msra.mxu0 %v3339_v24 }
 0x75d   : > { %v2412_v57 = vpop.f32.mrb[54].mxu1 }
 0x75e   : > { %v2495_v58 = vmul.f32 %v2412_v57, %v4083_v53  ;;  %v2414_v10 = vpop.f32.mrb[55].mxu1 }
 0x75f   : > { %v2496_v30 = vmul.f32 %v2414_v10, %v4085_v55 }
 0x760   : > { %v3343_v36 = vpack.c.bf16 %v2495_v58, %v2493_v51 }
 0x761   : > { %v3341_v61 = vpack.c.bf16 %v2496_v30, %v2494_v40  ;;  %v2418_v42 = vpop.f32.mrb[56].mxu1 }
 0x762   : > { %v2420_v32 = vpop.f32.mrb[57].mxu1  ;;  %v2497_v41 = vmul.f32 %v2418_v42, %v4091_v60 }
 0x763   : > { %3342 = vmatprep.subr.bf16.mxu0 %v3341_v61  ;;  %v2498_v53 = vmul.f32 %v2420_v32, %v4093_v62 }
 0x764   : > { %3344 = vmatpush1.bf16.msra.mxu0 %v3343_v36 }
 0x765   : > { %v2424_v39 = vpop.f32.mrb[58].mxu1 }
 0x766   : > { %v2499_v16 = vmul.f32 %v2424_v39, %v4099_v6  ;;  %v2426_v46 = vpop.f32.mrb[59].mxu1 }
 0x767   : > { %v2500_v54 = vmul.f32 %v2426_v46, %v4101_v13  ;;  %3156 = vmatmul.mubr.msk.f32.vlgmr.msra.gmra.mrb[60].mxu0 %vm4379_vm9, %v4280_v44 }
 0x768   : > { %v3347_v48 = vpack.c.bf16 %v2499_v16, %v2497_v41  ;;  %2658 = vmatprep.mubr.f32.mxu0 %v3491_v0 }
 0x769   : > { %v3345_v55 = vpack.c.bf16 %v2500_v54, %v2498_v53  ;;  %v2430_v18 = vpop.f32.mrb[60].mxu1 }
 0x76a   : > { %v2432_v22 = vpop.f32.mrb[61].mxu1  ;;  %v2501_v6 = vmul.f32 %v2430_v18, %v4107_v19 }
 0x76b   : > { %3346 = vmatprep.subr.bf16.mxu0 %v3345_v55  ;;  %v2502_v13 = vmul.f32 %v2432_v22, %v4109_v21 }
 0x76c   : > { %3348 = vmatpush1.bf16.msra.mxu0 %v3347_v48 }
 0x76d   : > { %v2436_v60 = vpop.f32.mrb[62].mxu1 }
 0x76e   : > { %v2503_v62 = vmul.f32 %v2436_v60, %v4115_v11  ;;  %v2438_v23 = vpop.f32.mrb[63].mxu1 }
 0x76f   : > { %v2504_v47 = vmul.f32 %v2438_v23, %v4117_v26 }
 0x770   : > { %v3351_v50 = vpack.c.bf16 %v2503_v62, %v2501_v6 }
 0x771   : > { %v3349_v5 = vpack.c.bf16 %v2504_v47, %v2502_v13  ;;  %v2442_v49 = vpop.f32.mrb[64].mxu1 }
 0x772   : > { %v2444_v59 = vpop.f32.mrb[65].mxu1  ;;  %v2505_v3 = vmul.f32 %v2442_v49, %v4123_v31 }
 0x773   : > { %3350 = vmatprep.subr.bf16.mxu0 %v3349_v5  ;;  %v2506_v19 = vmul.f32 %v2444_v59, %v4125_v33 }
 0x774   : > { %3352 = vmatpush1.bf16.msra.mxu0 %v3351_v50 }
 0x775   : > { %v2448_v1 = vpop.f32.mrb[66].mxu1 }
 0x776   : > { %v2507_v7 = vmul.f32 %v2448_v1, %v4131_v12  ;;  %v2450_v4 = vpop.f32.mrb[67].mxu1 }
 0x777   : > { %v2508_v11 = vmul.f32 %v2450_v4, %v4133_v38  ;;  %3157 = vmatmul.mubr.msk.f32.vlgmr.msra.gmra.mrb[62].mxu0 %vm4380_vm7, %v4280_v44 }
 0x778   : > { %v3355_v21 = vpack.c.bf16 %v2507_v7, %v2505_v3  ;;  %2732 = vmatprep.mubr.f32.mxu0 %v3491_v0 }
 0x779   : > { %v3353_v26 = vpack.c.bf16 %v2508_v11, %v2506_v19  ;;  %v2454_v34 = vpop.f32.mrb[68].mxu1 }
 0x77a   : > { %v2456_v37 = vpop.f32.mrb[69].mxu1  ;;  %v2509_v31 = vmul.f32 %v2454_v34, %v4139_v43 }
 0x77b   : > { %3354 = vmatprep.subr.bf16.mxu0 %v3353_v26  ;;  %v2510_v33 = vmul.f32 %v2456_v37, %v4141_v45 }
 0x77c   : > { %3356 = vmatpush1.bf16.msra.mxu0 %v3355_v21 }
 0x77d   : > { %v2460_v14 = vpop.f32.mrb[70].mxu1 }
 0x77e   : > { %v2511_v12 = vmul.f32 %v2460_v14, %v4147_v52  ;;  %v2462_v15 = vpop.f32.mrb[71].mxu1 }
 0x77f   : > { %v2512_v38 = vmul.f32 %v2462_v15, %v4149_v56 }
 0x780   : > { %v3359_v24 = vpack.c.bf16 %v2511_v12, %v2509_v31 }
 0x781   : > { %v3357_v9 = vpack.c.bf16 %v2512_v38, %v2510_v33  ;;  %v2466_v27 = vpop.f32.mrb[72].mxu1 }
 0x782   : > { %v2468_v29 = vpop.f32.mrb[73].mxu1  ;;  %v2513_v51 = vmul.f32 %v2466_v27, %v4155_v63 }
 0x783   : > { %3358 = vmatprep.subr.bf16.mxu0 %v3357_v9  ;;  %v2514_v43 = vmul.f32 %v2468_v29, %v4157_v2 }
 0x784   : > { %3360 = vmatpush1.bf16.msra.mxu0 %v3359_v24 }
 0x785   : > { %v2472_v57 = vpop.f32.mrb[74].mxu1 }
 0x786   : > { %v2515_v58 = vmul.f32 %v2472_v57, %v4163_v17  ;;  %v2474_v10 = vpop.f32.mrb[75].mxu1 }
 0x787   : > { %v2516_v52 = vmul.f32 %v2474_v10, %v4165_v20  ;;  %3160 = vmatmul.mubr.msk.f32.vlgmr.msra.gmra.mrb[64].mxu0 %vm4381_vm11, %v4280_v44 }
 0x788   : > { %v3363_v45 = vpack.c.bf16 %v2515_v58, %v2513_v51  ;;  %2806 = vmatprep.mubr.f32.mxu0 %v3491_v0 }
 0x789   : > { %v3361_v56 = vpack.c.bf16 %v2516_v52, %v2514_v43  ;;  %v2478_v40 = vpop.f32.mrb[76].mxu1 }
 0x78a   : > { %v2480_v30 = vpop.f32.mrb[77].mxu1  ;;  %v2517_v17 = vmul.f32 %v2478_v40, %v4171_v25 }
 0x78b   : > { %3362 = vmatprep.subr.bf16.mxu0 %v3361_v56  ;;  %v2518_v20 = vmul.f32 %v2480_v30, %v4173_v28 }
 0x78c   : > { %3364 = vmatpush1.bf16.msra.mxu0 %v3363_v45 }
 0x78d   : > { %v2484_v63 = vpop.f32.mrb[78].mxu1 }
 0x78e   : > { %v2519_v36 = vmul.f32 %v2484_v63, %v4179_v35  ;;  %v2486_v2 = vpop.f32.mrb[79].mxu1 }
 0x78f   : > { %v2520_v61 = vmul.f32 %v2486_v2, %v4181_v8 }
 0x790   : > { %v3367_v42 = vpack.c.bf16 %v2519_v36, %v2517_v17 }
 0x791   : > { %v3365_v32 = vpack.c.bf16 %v2520_v61, %v2518_v20 }
 0x793   : > { %3366 = vmatprep.subr.bf16.mxu0 %v3365_v32 }
 0x794   : > { %3368 = vmatpush1.bf16.msra.mxu0 %v3367_v42 }
 0x797   : > { %3163 = vmatmul.mubr.msk.f32.vlgmr.msra.gmra.mrb[66].mxu0 %vm4382_vm12, %v4280_v44 }
 0x83a   : > { %v2587_v0 = vpop.f32.mrb[60].mxu0 }
 0x83b   : > { %2592 = vst [vmem:[%s626_s26] sm:$0xff] %v2587_v0  ;;  %v2589_v25 = vpop.f32.mrb[61].mxu0 }
 0x83c   : > { %2593 = vst [vmem:[%s626_s26 + $0x8] sm:$0xff] %v2589_v25 }
 0x84a   : > { %v2660_v35 = vpop.f32.mrb[62].mxu0 }
 0x84b   : > { %3158 = vst [vmem:[%s626_s26 + $0x10] sm:$0xff] %v2660_v35  ;;  %v2662_v28 = vpop.f32.mrb[63].mxu0 }
 0x84c   : > { %3159 = vst [vmem:[%s626_s26 + $0x18] sm:$0xff] %v2662_v28 }
 0x85a   : > { %v2734_v8 = vpop.f32.mrb[64].mxu0 }
 0x85b   : > { %3161 = vst [vmem:[%s626_s26 + $0x20] sm:$0xff] %v2734_v8  ;;  %v2736_v39 = vpop.f32.mrb[65].mxu0 }
 0x85c   : > { %3162 = vst [vmem:[%s626_s26 + $0x28] sm:$0xff] %v2736_v39 }
 0x86a   : > { %v2808_v41 = vpop.f32.mrb[66].mxu0 }
 0x86b   : > { %3164 = vst [vmem:[%s626_s26 + $0x30] sm:$0xff] %v2808_v41  ;;  %v2810_v16 = vpop.f32.mrb[67].mxu0 }
 0x86c   : > { %3165 = vst [vmem:[%s626_s26 + $0x38] sm:$0xff] %v2810_v16 }
 0x86d PF: > { %s27_s23 = sadd.s32 1, %s3489_s23   ;;  %s4383_s21 = smov %s3485_s22 }
 0x86e   : > { %p24_p5 = scmp.ge.s32.totalorder %s27_s23, 4   ;;  %s4384_s22 = smov %s4386_s24 }
 0x870   :  { %26 = sbr.rel (!%p24_p5) target bundleno = 2 (0x2), region = 136 }

</bundles_post_ra>
